<compile_context>
chip_gen: v7x
topology: tpu7x:2x2x1
jax: 0.10.0
libtpu: 0.0.40
codegen_flags: <defaults>
</compile_context>

<pallas_src>
import jax
import jax.numpy as jnp
from jax.experimental import pallas as pl
from jax.experimental.pallas import tpu as pltpu


_LANES = 128  # batch elements per grid step (mapped to the vreg lane axis)


def _conv2d_block_kernel(w_ref, v_ref, o_ref):
    """One grid step = `bt` images, batch on the lane axis.

    w_ref : SMEM (F*4,)      flattened 2x2 conv taps, tap index = ki*2 + kj
    v_ref : VMEM (9, P, bt)  V[r*3+c, p*Wp+q, b] = x[b, 2p+r, 2q+c]
                             (3x3 input neighbourhood of each pooled output pixel,
                              gathered once in the wrapper)
    o_ref : VMEM (F, P, bt)  sum-pooled ReLU(conv) output, lane-dense
    """
    n_filters = o_ref.shape[0]
    # Small F -> trace-time unrolled Python loop.  For large F switch to
    # lax.fori_loop(..., unroll=True) or a filter grid axis.
    for f in range(n_filters):
        # Hoist the four scalar taps once per filter (cheap SMEM scalar reads).
        w00 = w_ref[4 * f + 0]
        w01 = w_ref[4 * f + 1]
        w10 = w_ref[4 * f + 2]
        w11 = w_ref[4 * f + 3]
        acc = None
        for di in range(2):            # 2x2 pool-window position (di, dj)
            for dj in range(2):
                conv = (w00 * v_ref[(di + 0) * 3 + (dj + 0)]
                        + w01 * v_ref[(di + 0) * 3 + (dj + 1)]
                        + w10 * v_ref[(di + 1) * 3 + (dj + 0)]
                        + w11 * v_ref[(di + 1) * 3 + (dj + 1)])   # (P, bt)
                r = jnp.maximum(conv, 0.0)                         # ReLU
                acc = r if acc is None else acc + r                # LPPool2d(norm=1) == sum pool
        o_ref[f] = acc


def conv2d_block_forward(x, weight, *, batch_tile=_LANES):
    """x: (B, N, N) float32, weight: (F, 1, 2, 2) float32 -> (B, F, Hp, Wp) float32."""
    B, N, _ = x.shape
    n_filters = weight.shape[0]
    Hp = (N - 1) // 2                 # conv VALID 2x2 (stride 1) then 2x2/stride-2 floor pool
    P = Hp * Hp

    x = x.astype(jnp.float32)
    w_flat = weight.reshape(n_filters * 4).astype(jnp.float32)   # 1-D SMEM weights

    # ---- wrapper-side layout plumbing (no arithmetic) ------------------------
    # Gather the 3x3 input neighbourhood of every pooled output pixel and put the
    # batch on the lane axis.  This replaces in-kernel unaligned tap slices and the
    # one-hot pooling matmuls with a single strided relayout handled by XLA.
    slabs = [x[:, r:r + 2 * Hp:2, c:c + 2 * Hp:2]      # each (B, Hp, Wp)
             for r in range(3) for c in range(3)]
    v = jnp.stack(slabs, axis=0).reshape(9, B, P)      # (9, B, P)
    v = jnp.transpose(v, (0, 2, 1))                    # (9, P, B)  batch -> lanes

    bt = batch_tile
    b_pad = pl.cdiv(B, bt) * bt
    if b_pad != B:                                     # zero-pad lanes; sliced off below
        v = jnp.pad(v, ((0, 0), (0, 0), (0, b_pad - B)))
    grid = (b_pad // bt,)

    out = pl.pallas_call(
        _conv2d_block_kernel,
        out_shape=jax.ShapeDtypeStruct((n_filters, P, b_pad), jnp.float32),
        grid=grid,
        in_specs=[
            pl.BlockSpec(memory_space=pltpu.SMEM),                        # (F*4,) taps
            pl.BlockSpec((9, P, bt), lambda g: (0, 0, g)),                # 128 images / step
        ],
        out_specs=pl.BlockSpec((n_filters, P, bt), lambda g: (0, 0, g)),  # lane-dense output
        compiler_params=pltpu.CompilerParams(
            dimension_semantics=("parallel",),   # batch steps shard across v7x's 2 TCs
        ),
    )(w_flat, v)

    # Back to PyTorch NCHW: (F, P, B_pad) -> (B, F, Hp, Wp)
    out = out[:, :, :B]
    return jnp.transpose(out, (2, 0, 1)).reshape(B, n_filters, Hp, Hp)


def _reference(x, weight):
    """Pure-JAX reference of the PyTorch forward pass (for verification)."""
    B, N, _ = x.shape
    xin = x.reshape(B, 1, N, N).astype(jnp.float32)
    conv = jax.lax.conv_general_dilated(
        xin, weight.astype(jnp.float32), window_strides=(1, 1), padding="VALID",
        dimension_numbers=("NCHW", "OIHW", "NCHW"))
    relu = jnp.maximum(conv, 0.0)
    Hp = (N - 1) // 2
    crop = relu[:, :, : 2 * Hp, : 2 * Hp]
    return crop.reshape(B, -1, Hp, 2, Hp, 2).sum(axis=(3, 5))


if __name__ == "__main__":
    B, N, n_filters = 2, 16, 4

    key = jax.random.PRNGKey(0)
    kx, kw = jax.random.split(key)
    x = jax.random.normal(kx, (B, N, N), dtype=jnp.float32)
    # Deterministic synthetic init for Conv2d(1, n_filters, 2, bias=False):
    weight = 0.5 * jax.random.normal(kw, (n_filters, 1, 2, 2), dtype=jnp.float32)

    out = conv2d_block_forward(x, weight)
    out = jax.block_until_ready(out)

    ref = _reference(x, weight)
    assert out.shape == (B, n_filters, (N - 1) // 2, (N - 1) // 2)
    assert jnp.allclose(out, ref, atol=1e-4, rtol=1e-4), "mismatch vs JAX reference"
    print("KERNEL_OK")
</pallas_src>

<mosaic_0001>
module attributes {stable_mosaic.version = 11 : i64} {
  func.func @_conv2d_block_kernel(%arg0: i32, %arg1: memref<16xf32, #tpu.memory_space<smem>>, %arg2: memref<9x49x128xf32, #tpu.memory_space<vmem>>, %arg3: memref<4x49x128xf32, #tpu.memory_space<vmem>>) attributes {dimension_semantics = [#tpu.dimension_semantics<parallel>], iteration_bounds = array<i64: 1>, scalar_prefetch = 0 : i64, scratch_operands = 0 : i64, tpu.core_type = #tpu.core_type<tc>, window_params = [{transform_indices = @transform_0, window_bounds = array<i64: 16>}, {transform_indices = @transform_1, window_bounds = array<i64: 9, 49, 128>}, {transform_indices = @transform_2, window_bounds = array<i64: 4, 49, 128>}]} {
    %c0 = arith.constant 0 : index
    %0 = memref.load %arg1[%c0] : memref<16xf32, #tpu.memory_space<smem>>
    %c1 = arith.constant 1 : index
    %1 = memref.load %arg1[%c1] : memref<16xf32, #tpu.memory_space<smem>>
    %c2 = arith.constant 2 : index
    %2 = memref.load %arg1[%c2] : memref<16xf32, #tpu.memory_space<smem>>
    %c3 = arith.constant 3 : index
    %3 = memref.load %arg1[%c3] : memref<16xf32, #tpu.memory_space<smem>>
    %c0_0 = arith.constant 0 : index
    %c0_1 = arith.constant 0 : index
    %c0_2 = arith.constant 0 : index
    %4 = vector.load %arg2[%c0_0, %c0_1, %c0_2] : memref<9x49x128xf32, #tpu.memory_space<vmem>>, vector<1x49x128xf32>
    %5 = vector.shape_cast %4 : vector<1x49x128xf32> to vector<49x128xf32>
    %6 = vector.broadcast %0 : f32 to vector<49x128xf32>
    %7 = arith.mulf %6, %5 : vector<49x128xf32>
    %c1_3 = arith.constant 1 : index
    %c0_4 = arith.constant 0 : index
    %c0_5 = arith.constant 0 : index
    %8 = vector.load %arg2[%c1_3, %c0_4, %c0_5] : memref<9x49x128xf32, #tpu.memory_space<vmem>>, vector<1x49x128xf32>
    %9 = vector.shape_cast %8 : vector<1x49x128xf32> to vector<49x128xf32>
    %10 = vector.broadcast %1 : f32 to vector<49x128xf32>
    %11 = arith.mulf %10, %9 : vector<49x128xf32>
    %12 = arith.addf %7, %11 : vector<49x128xf32>
    %c3_6 = arith.constant 3 : index
    %c0_7 = arith.constant 0 : index
    %c0_8 = arith.constant 0 : index
    %13 = vector.load %arg2[%c3_6, %c0_7, %c0_8] : memref<9x49x128xf32, #tpu.memory_space<vmem>>, vector<1x49x128xf32>
    %14 = vector.shape_cast %13 : vector<1x49x128xf32> to vector<49x128xf32>
    %15 = vector.broadcast %2 : f32 to vector<49x128xf32>
    %16 = arith.mulf %15, %14 : vector<49x128xf32>
    %17 = arith.addf %12, %16 : vector<49x128xf32>
    %c4 = arith.constant 4 : index
    %c0_9 = arith.constant 0 : index
    %c0_10 = arith.constant 0 : index
    %18 = vector.load %arg2[%c4, %c0_9, %c0_10] : memref<9x49x128xf32, #tpu.memory_space<vmem>>, vector<1x49x128xf32>
    %19 = vector.shape_cast %18 : vector<1x49x128xf32> to vector<49x128xf32>
    %20 = vector.broadcast %3 : f32 to vector<49x128xf32>
    %21 = arith.mulf %20, %19 : vector<49x128xf32>
    %22 = arith.addf %17, %21 : vector<49x128xf32>
    %cst = arith.constant 0.000000e+00 : f32
    %23 = vector.broadcast %cst : f32 to vector<49x128xf32>
    %24 = arith.maximumf %22, %23 : vector<49x128xf32>
    %c1_11 = arith.constant 1 : index
    %c0_12 = arith.constant 0 : index
    %c0_13 = arith.constant 0 : index
    %25 = vector.load %arg2[%c1_11, %c0_12, %c0_13] : memref<9x49x128xf32, #tpu.memory_space<vmem>>, vector<1x49x128xf32>
    %26 = vector.shape_cast %25 : vector<1x49x128xf32> to vector<49x128xf32>
    %27 = vector.broadcast %0 : f32 to vector<49x128xf32>
    %28 = arith.mulf %27, %26 : vector<49x128xf32>
    %c2_14 = arith.constant 2 : index
    %c0_15 = arith.constant 0 : index
    %c0_16 = arith.constant 0 : index
    %29 = vector.load %arg2[%c2_14, %c0_15, %c0_16] : memref<9x49x128xf32, #tpu.memory_space<vmem>>, vector<1x49x128xf32>
    %30 = vector.shape_cast %29 : vector<1x49x128xf32> to vector<49x128xf32>
    %31 = vector.broadcast %1 : f32 to vector<49x128xf32>
    %32 = arith.mulf %31, %30 : vector<49x128xf32>
    %33 = arith.addf %28, %32 : vector<49x128xf32>
    %c4_17 = arith.constant 4 : index
    %c0_18 = arith.constant 0 : index
    %c0_19 = arith.constant 0 : index
    %34 = vector.load %arg2[%c4_17, %c0_18, %c0_19] : memref<9x49x128xf32, #tpu.memory_space<vmem>>, vector<1x49x128xf32>
    %35 = vector.shape_cast %34 : vector<1x49x128xf32> to vector<49x128xf32>
    %36 = vector.broadcast %2 : f32 to vector<49x128xf32>
    %37 = arith.mulf %36, %35 : vector<49x128xf32>
    %38 = arith.addf %33, %37 : vector<49x128xf32>
    %c5 = arith.constant 5 : index
    %c0_20 = arith.constant 0 : index
    %c0_21 = arith.constant 0 : index
    %39 = vector.load %arg2[%c5, %c0_20, %c0_21] : memref<9x49x128xf32, #tpu.memory_space<vmem>>, vector<1x49x128xf32>
    %40 = vector.shape_cast %39 : vector<1x49x128xf32> to vector<49x128xf32>
    %41 = vector.broadcast %3 : f32 to vector<49x128xf32>
    %42 = arith.mulf %41, %40 : vector<49x128xf32>
    %43 = arith.addf %38, %42 : vector<49x128xf32>
    %cst_22 = arith.constant 0.000000e+00 : f32
    %44 = vector.broadcast %cst_22 : f32 to vector<49x128xf32>
    %45 = arith.maximumf %43, %44 : vector<49x128xf32>
    %46 = arith.addf %24, %45 : vector<49x128xf32>
    %c3_23 = arith.constant 3 : index
    %c0_24 = arith.constant 0 : index
    %c0_25 = arith.constant 0 : index
    %47 = vector.load %arg2[%c3_23, %c0_24, %c0_25] : memref<9x49x128xf32, #tpu.memory_space<vmem>>, vector<1x49x128xf32>
    %48 = vector.shape_cast %47 : vector<1x49x128xf32> to vector<49x128xf32>
    %49 = vector.broadcast %0 : f32 to vector<49x128xf32>
    %50 = arith.mulf %49, %48 : vector<49x128xf32>
    %c4_26 = arith.constant 4 : index
    %c0_27 = arith.constant 0 : index
    %c0_28 = arith.constant 0 : index
    %51 = vector.load %arg2[%c4_26, %c0_27, %c0_28] : memref<9x49x128xf32, #tpu.memory_space<vmem>>, vector<1x49x128xf32>
    %52 = vector.shape_cast %51 : vector<1x49x128xf32> to vector<49x128xf32>
    %53 = vector.broadcast %1 : f32 to vector<49x128xf32>
    %54 = arith.mulf %53, %52 : vector<49x128xf32>
    %55 = arith.addf %50, %54 : vector<49x128xf32>
    %c6 = arith.constant 6 : index
    %c0_29 = arith.constant 0 : index
    %c0_30 = arith.constant 0 : index
    %56 = vector.load %arg2[%c6, %c0_29, %c0_30] : memref<9x49x128xf32, #tpu.memory_space<vmem>>, vector<1x49x128xf32>
    %57 = vector.shape_cast %56 : vector<1x49x128xf32> to vector<49x128xf32>
    %58 = vector.broadcast %2 : f32 to vector<49x128xf32>
    %59 = arith.mulf %58, %57 : vector<49x128xf32>
    %60 = arith.addf %55, %59 : vector<49x128xf32>
    %c7 = arith.constant 7 : index
    %c0_31 = arith.constant 0 : index
    %c0_32 = arith.constant 0 : index
    %61 = vector.load %arg2[%c7, %c0_31, %c0_32] : memref<9x49x128xf32, #tpu.memory_space<vmem>>, vector<1x49x128xf32>
    %62 = vector.shape_cast %61 : vector<1x49x128xf32> to vector<49x128xf32>
    %63 = vector.broadcast %3 : f32 to vector<49x128xf32>
    %64 = arith.mulf %63, %62 : vector<49x128xf32>
    %65 = arith.addf %60, %64 : vector<49x128xf32>
    %cst_33 = arith.constant 0.000000e+00 : f32
    %66 = vector.broadcast %cst_33 : f32 to vector<49x128xf32>
    %67 = arith.maximumf %65, %66 : vector<49x128xf32>
    %68 = arith.addf %46, %67 : vector<49x128xf32>
    %c4_34 = arith.constant 4 : index
    %c0_35 = arith.constant 0 : index
    %c0_36 = arith.constant 0 : index
    %69 = vector.load %arg2[%c4_34, %c0_35, %c0_36] : memref<9x49x128xf32, #tpu.memory_space<vmem>>, vector<1x49x128xf32>
    %70 = vector.shape_cast %69 : vector<1x49x128xf32> to vector<49x128xf32>
    %71 = vector.broadcast %0 : f32 to vector<49x128xf32>
    %72 = arith.mulf %71, %70 : vector<49x128xf32>
    %c5_37 = arith.constant 5 : index
    %c0_38 = arith.constant 0 : index
    %c0_39 = arith.constant 0 : index
    %73 = vector.load %arg2[%c5_37, %c0_38, %c0_39] : memref<9x49x128xf32, #tpu.memory_space<vmem>>, vector<1x49x128xf32>
    %74 = vector.shape_cast %73 : vector<1x49x128xf32> to vector<49x128xf32>
    %75 = vector.broadcast %1 : f32 to vector<49x128xf32>
    %76 = arith.mulf %75, %74 : vector<49x128xf32>
    %77 = arith.addf %72, %76 : vector<49x128xf32>
    %c7_40 = arith.constant 7 : index
    %c0_41 = arith.constant 0 : index
    %c0_42 = arith.constant 0 : index
    %78 = vector.load %arg2[%c7_40, %c0_41, %c0_42] : memref<9x49x128xf32, #tpu.memory_space<vmem>>, vector<1x49x128xf32>
    %79 = vector.shape_cast %78 : vector<1x49x128xf32> to vector<49x128xf32>
    %80 = vector.broadcast %2 : f32 to vector<49x128xf32>
    %81 = arith.mulf %80, %79 : vector<49x128xf32>
    %82 = arith.addf %77, %81 : vector<49x128xf32>
    %c8 = arith.constant 8 : index
    %c0_43 = arith.constant 0 : index
    %c0_44 = arith.constant 0 : index
    %83 = vector.load %arg2[%c8, %c0_43, %c0_44] : memref<9x49x128xf32, #tpu.memory_space<vmem>>, vector<1x49x128xf32>
    %84 = vector.shape_cast %83 : vector<1x49x128xf32> to vector<49x128xf32>
    %85 = vector.broadcast %3 : f32 to vector<49x128xf32>
    %86 = arith.mulf %85, %84 : vector<49x128xf32>
    %87 = arith.addf %82, %86 : vector<49x128xf32>
    %cst_45 = arith.constant 0.000000e+00 : f32
    %88 = vector.broadcast %cst_45 : f32 to vector<49x128xf32>
    %89 = arith.maximumf %87, %88 : vector<49x128xf32>
    %90 = arith.addf %68, %89 : vector<49x128xf32>
    %c0_46 = arith.constant 0 : index
    %c0_47 = arith.constant 0 : index
    %c0_48 = arith.constant 0 : index
    %91 = vector.load %arg3[%c0_46, %c0_47, %c0_48] : memref<4x49x128xf32, #tpu.memory_space<vmem>>, vector<1x49x128xf32>
    %92 = vector.shape_cast %91 : vector<1x49x128xf32> to vector<49x128xf32>
    %93 = vector.shape_cast %90 : vector<49x128xf32> to vector<1x49x128xf32>
    tpu.vector_store %arg3[%c0_46, %c0_47, %c0_48], %93 {strides = array<i32>} : memref<4x49x128xf32, #tpu.memory_space<vmem>>, vector<1x49x128xf32>,
    %c4_49 = arith.constant 4 : index
    %94 = memref.load %arg1[%c4_49] : memref<16xf32, #tpu.memory_space<smem>>
    %c5_50 = arith.constant 5 : index
    %95 = memref.load %arg1[%c5_50] : memref<16xf32, #tpu.memory_space<smem>>
    %c6_51 = arith.constant 6 : index
    %96 = memref.load %arg1[%c6_51] : memref<16xf32, #tpu.memory_space<smem>>
    %c7_52 = arith.constant 7 : index
    %97 = memref.load %arg1[%c7_52] : memref<16xf32, #tpu.memory_space<smem>>
    %c0_53 = arith.constant 0 : index
    %c0_54 = arith.constant 0 : index
    %c0_55 = arith.constant 0 : index
    %98 = vector.load %arg2[%c0_53, %c0_54, %c0_55] : memref<9x49x128xf32, #tpu.memory_space<vmem>>, vector<1x49x128xf32>
    %99 = vector.shape_cast %98 : vector<1x49x128xf32> to vector<49x128xf32>
    %100 = vector.broadcast %94 : f32 to vector<49x128xf32>
    %101 = arith.mulf %100, %99 : vector<49x128xf32>
    %c1_56 = arith.constant 1 : index
    %c0_57 = arith.constant 0 : index
    %c0_58 = arith.constant 0 : index
    %102 = vector.load %arg2[%c1_56, %c0_57, %c0_58] : memref<9x49x128xf32, #tpu.memory_space<vmem>>, vector<1x49x128xf32>
    %103 = vector.shape_cast %102 : vector<1x49x128xf32> to vector<49x128xf32>
    %104 = vector.broadcast %95 : f32 to vector<49x128xf32>
    %105 = arith.mulf %104, %103 : vector<49x128xf32>
    %106 = arith.addf %101, %105 : vector<49x128xf32>
    %c3_59 = arith.constant 3 : index
    %c0_60 = arith.constant 0 : index
    %c0_61 = arith.constant 0 : index
    %107 = vector.load %arg2[%c3_59, %c0_60, %c0_61] : memref<9x49x128xf32, #tpu.memory_space<vmem>>, vector<1x49x128xf32>
    %108 = vector.shape_cast %107 : vector<1x49x128xf32> to vector<49x128xf32>
    %109 = vector.broadcast %96 : f32 to vector<49x128xf32>
    %110 = arith.mulf %109, %108 : vector<49x128xf32>
    %111 = arith.addf %106, %110 : vector<49x128xf32>
    %c4_62 = arith.constant 4 : index
    %c0_63 = arith.constant 0 : index
    %c0_64 = arith.constant 0 : index
    %112 = vector.load %arg2[%c4_62, %c0_63, %c0_64] : memref<9x49x128xf32, #tpu.memory_space<vmem>>, vector<1x49x128xf32>
    %113 = vector.shape_cast %112 : vector<1x49x128xf32> to vector<49x128xf32>
    %114 = vector.broadcast %97 : f32 to vector<49x128xf32>
    %115 = arith.mulf %114, %113 : vector<49x128xf32>
    %116 = arith.addf %111, %115 : vector<49x128xf32>
    %cst_65 = arith.constant 0.000000e+00 : f32
    %117 = vector.broadcast %cst_65 : f32 to vector<49x128xf32>
    %118 = arith.maximumf %116, %117 : vector<49x128xf32>
    %c1_66 = arith.constant 1 : index
    %c0_67 = arith.constant 0 : index
    %c0_68 = arith.constant 0 : index
    %119 = vector.load %arg2[%c1_66, %c0_67, %c0_68] : memref<9x49x128xf32, #tpu.memory_space<vmem>>, vector<1x49x128xf32>
    %120 = vector.shape_cast %119 : vector<1x49x128xf32> to vector<49x128xf32>
    %121 = vector.broadcast %94 : f32 to vector<49x128xf32>
    %122 = arith.mulf %121, %120 : vector<49x128xf32>
    %c2_69 = arith.constant 2 : index
    %c0_70 = arith.constant 0 : index
    %c0_71 = arith.constant 0 : index
    %123 = vector.load %arg2[%c2_69, %c0_70, %c0_71] : memref<9x49x128xf32, #tpu.memory_space<vmem>>, vector<1x49x128xf32>
    %124 = vector.shape_cast %123 : vector<1x49x128xf32> to vector<49x128xf32>
    %125 = vector.broadcast %95 : f32 to vector<49x128xf32>
    %126 = arith.mulf %125, %124 : vector<49x128xf32>
    %127 = arith.addf %122, %126 : vector<49x128xf32>
    %c4_72 = arith.constant 4 : index
    %c0_73 = arith.constant 0 : index
    %c0_74 = arith.constant 0 : index
    %128 = vector.load %arg2[%c4_72, %c0_73, %c0_74] : memref<9x49x128xf32, #tpu.memory_space<vmem>>, vector<1x49x128xf32>
    %129 = vector.shape_cast %128 : vector<1x49x128xf32> to vector<49x128xf32>
    %130 = vector.broadcast %96 : f32 to vector<49x128xf32>
    %131 = arith.mulf %130, %129 : vector<49x128xf32>
    %132 = arith.addf %127, %131 : vector<49x128xf32>
    %c5_75 = arith.constant 5 : index
    %c0_76 = arith.constant 0 : index
    %c0_77 = arith.constant 0 : index
    %133 = vector.load %arg2[%c5_75, %c0_76, %c0_77] : memref<9x49x128xf32, #tpu.memory_space<vmem>>, vector<1x49x128xf32>
    %134 = vector.shape_cast %133 : vector<1x49x128xf32> to vector<49x128xf32>
    %135 = vector.broadcast %97 : f32 to vector<49x128xf32>
    %136 = arith.mulf %135, %134 : vector<49x128xf32>
    %137 = arith.addf %132, %136 : vector<49x128xf32>
    %cst_78 = arith.constant 0.000000e+00 : f32
    %138 = vector.broadcast %cst_78 : f32 to vector<49x128xf32>
    %139 = arith.maximumf %137, %138 : vector<49x128xf32>
    %140 = arith.addf %118, %139 : vector<49x128xf32>
    %c3_79 = arith.constant 3 : index
    %c0_80 = arith.constant 0 : index
    %c0_81 = arith.constant 0 : index
    %141 = vector.load %arg2[%c3_79, %c0_80, %c0_81] : memref<9x49x128xf32, #tpu.memory_space<vmem>>, vector<1x49x128xf32>
    %142 = vector.shape_cast %141 : vector<1x49x128xf32> to vector<49x128xf32>
    %143 = vector.broadcast %94 : f32 to vector<49x128xf32>
    %144 = arith.mulf %143, %142 : vector<49x128xf32>
    %c4_82 = arith.constant 4 : index
    %c0_83 = arith.constant 0 : index
    %c0_84 = arith.constant 0 : index
    %145 = vector.load %arg2[%c4_82, %c0_83, %c0_84] : memref<9x49x128xf32, #tpu.memory_space<vmem>>, vector<1x49x128xf32>
    %146 = vector.shape_cast %145 : vector<1x49x128xf32> to vector<49x128xf32>
    %147 = vector.broadcast %95 : f32 to vector<49x128xf32>
    %148 = arith.mulf %147, %146 : vector<49x128xf32>
    %149 = arith.addf %144, %148 : vector<49x128xf32>
    %c6_85 = arith.constant 6 : index
    %c0_86 = arith.constant 0 : index
    %c0_87 = arith.constant 0 : index
    %150 = vector.load %arg2[%c6_85, %c0_86, %c0_87] : memref<9x49x128xf32, #tpu.memory_space<vmem>>, vector<1x49x128xf32>
    %151 = vector.shape_cast %150 : vector<1x49x128xf32> to vector<49x128xf32>
    %152 = vector.broadcast %96 : f32 to vector<49x128xf32>
    %153 = arith.mulf %152, %151 : vector<49x128xf32>
    %154 = arith.addf %149, %153 : vector<49x128xf32>
    %c7_88 = arith.constant 7 : index
    %c0_89 = arith.constant 0 : index
    %c0_90 = arith.constant 0 : index
    %155 = vector.load %arg2[%c7_88, %c0_89, %c0_90] : memref<9x49x128xf32, #tpu.memory_space<vmem>>, vector<1x49x128xf32>
    %156 = vector.shape_cast %155 : vector<1x49x128xf32> to vector<49x128xf32>
    %157 = vector.broadcast %97 : f32 to vector<49x128xf32>
    %158 = arith.mulf %157, %156 : vector<49x128xf32>
    %159 = arith.addf %154, %158 : vector<49x128xf32>
    %cst_91 = arith.constant 0.000000e+00 : f32
    %160 = vector.broadcast %cst_91 : f32 to vector<49x128xf32>
    %161 = arith.maximumf %159, %160 : vector<49x128xf32>
    %162 = arith.addf %140, %161 : vector<49x128xf32>
    %c4_92 = arith.constant 4 : index
    %c0_93 = arith.constant 0 : index
    %c0_94 = arith.constant 0 : index
    %163 = vector.load %arg2[%c4_92, %c0_93, %c0_94] : memref<9x49x128xf32, #tpu.memory_space<vmem>>, vector<1x49x128xf32>
    %164 = vector.shape_cast %163 : vector<1x49x128xf32> to vector<49x128xf32>
    %165 = vector.broadcast %94 : f32 to vector<49x128xf32>
    %166 = arith.mulf %165, %164 : vector<49x128xf32>
    %c5_95 = arith.constant 5 : index
    %c0_96 = arith.constant 0 : index
    %c0_97 = arith.constant 0 : index
    %167 = vector.load %arg2[%c5_95, %c0_96, %c0_97] : memref<9x49x128xf32, #tpu.memory_space<vmem>>, vector<1x49x128xf32>
    %168 = vector.shape_cast %167 : vector<1x49x128xf32> to vector<49x128xf32>
    %169 = vector.broadcast %95 : f32 to vector<49x128xf32>
    %170 = arith.mulf %169, %168 : vector<49x128xf32>
    %171 = arith.addf %166, %170 : vector<49x128xf32>
    %c7_98 = arith.constant 7 : index
    %c0_99 = arith.constant 0 : index
    %c0_100 = arith.constant 0 : index
    %172 = vector.load %arg2[%c7_98, %c0_99, %c0_100] : memref<9x49x128xf32, #tpu.memory_space<vmem>>, vector<1x49x128xf32>
    %173 = vector.shape_cast %172 : vector<1x49x128xf32> to vector<49x128xf32>
    %174 = vector.broadcast %96 : f32 to vector<49x128xf32>
    %175 = arith.mulf %174, %173 : vector<49x128xf32>
    %176 = arith.addf %171, %175 : vector<49x128xf32>
    %c8_101 = arith.constant 8 : index
    %c0_102 = arith.constant 0 : index
    %c0_103 = arith.constant 0 : index
    %177 = vector.load %arg2[%c8_101, %c0_102, %c0_103] : memref<9x49x128xf32, #tpu.memory_space<vmem>>, vector<1x49x128xf32>
    %178 = vector.shape_cast %177 : vector<1x49x128xf32> to vector<49x128xf32>
    %179 = vector.broadcast %97 : f32 to vector<49x128xf32>
    %180 = arith.mulf %179, %178 : vector<49x128xf32>
    %181 = arith.addf %176, %180 : vector<49x128xf32>
    %cst_104 = arith.constant 0.000000e+00 : f32
    %182 = vector.broadcast %cst_104 : f32 to vector<49x128xf32>
    %183 = arith.maximumf %181, %182 : vector<49x128xf32>
    %184 = arith.addf %162, %183 : vector<49x128xf32>
    %c1_105 = arith.constant 1 : index
    %c0_106 = arith.constant 0 : index
    %c0_107 = arith.constant 0 : index
    %185 = vector.load %arg3[%c1_105, %c0_106, %c0_107] : memref<4x49x128xf32, #tpu.memory_space<vmem>>, vector<1x49x128xf32>
    %186 = vector.shape_cast %185 : vector<1x49x128xf32> to vector<49x128xf32>
    %187 = vector.shape_cast %184 : vector<49x128xf32> to vector<1x49x128xf32>
    tpu.vector_store %arg3[%c1_105, %c0_106, %c0_107], %187 {strides = array<i32>} : memref<4x49x128xf32, #tpu.memory_space<vmem>>, vector<1x49x128xf32>,
    %c8_108 = arith.constant 8 : index
    %188 = memref.load %arg1[%c8_108] : memref<16xf32, #tpu.memory_space<smem>>
    %c9 = arith.constant 9 : index
    %189 = memref.load %arg1[%c9] : memref<16xf32, #tpu.memory_space<smem>>
    %c10 = arith.constant 10 : index
    %190 = memref.load %arg1[%c10] : memref<16xf32, #tpu.memory_space<smem>>
    %c11 = arith.constant 11 : index
    %191 = memref.load %arg1[%c11] : memref<16xf32, #tpu.memory_space<smem>>
    %c0_109 = arith.constant 0 : index
    %c0_110 = arith.constant 0 : index
    %c0_111 = arith.constant 0 : index
    %192 = vector.load %arg2[%c0_109, %c0_110, %c0_111] : memref<9x49x128xf32, #tpu.memory_space<vmem>>, vector<1x49x128xf32>
    %193 = vector.shape_cast %192 : vector<1x49x128xf32> to vector<49x128xf32>
    %194 = vector.broadcast %188 : f32 to vector<49x128xf32>
    %195 = arith.mulf %194, %193 : vector<49x128xf32>
    %c1_112 = arith.constant 1 : index
    %c0_113 = arith.constant 0 : index
    %c0_114 = arith.constant 0 : index
    %196 = vector.load %arg2[%c1_112, %c0_113, %c0_114] : memref<9x49x128xf32, #tpu.memory_space<vmem>>, vector<1x49x128xf32>
    %197 = vector.shape_cast %196 : vector<1x49x128xf32> to vector<49x128xf32>
    %198 = vector.broadcast %189 : f32 to vector<49x128xf32>
    %199 = arith.mulf %198, %197 : vector<49x128xf32>
    %200 = arith.addf %195, %199 : vector<49x128xf32>
    %c3_115 = arith.constant 3 : index
    %c0_116 = arith.constant 0 : index
    %c0_117 = arith.constant 0 : index
    %201 = vector.load %arg2[%c3_115, %c0_116, %c0_117] : memref<9x49x128xf32, #tpu.memory_space<vmem>>, vector<1x49x128xf32>
    %202 = vector.shape_cast %201 : vector<1x49x128xf32> to vector<49x128xf32>
    %203 = vector.broadcast %190 : f32 to vector<49x128xf32>
    %204 = arith.mulf %203, %202 : vector<49x128xf32>
    %205 = arith.addf %200, %204 : vector<49x128xf32>
    %c4_118 = arith.constant 4 : index
    %c0_119 = arith.constant 0 : index
    %c0_120 = arith.constant 0 : index
    %206 = vector.load %arg2[%c4_118, %c0_119, %c0_120] : memref<9x49x128xf32, #tpu.memory_space<vmem>>, vector<1x49x128xf32>
    %207 = vector.shape_cast %206 : vector<1x49x128xf32> to vector<49x128xf32>
    %208 = vector.broadcast %191 : f32 to vector<49x128xf32>
    %209 = arith.mulf %208, %207 : vector<49x128xf32>
    %210 = arith.addf %205, %209 : vector<49x128xf32>
    %cst_121 = arith.constant 0.000000e+00 : f32
    %211 = vector.broadcast %cst_121 : f32 to vector<49x128xf32>
    %212 = arith.maximumf %210, %211 : vector<49x128xf32>
    %c1_122 = arith.constant 1 : index
    %c0_123 = arith.constant 0 : index
    %c0_124 = arith.constant 0 : index
    %213 = vector.load %arg2[%c1_122, %c0_123, %c0_124] : memref<9x49x128xf32, #tpu.memory_space<vmem>>, vector<1x49x128xf32>
    %214 = vector.shape_cast %213 : vector<1x49x128xf32> to vector<49x128xf32>
    %215 = vector.broadcast %188 : f32 to vector<49x128xf32>
    %216 = arith.mulf %215, %214 : vector<49x128xf32>
    %c2_125 = arith.constant 2 : index
    %c0_126 = arith.constant 0 : index
    %c0_127 = arith.constant 0 : index
    %217 = vector.load %arg2[%c2_125, %c0_126, %c0_127] : memref<9x49x128xf32, #tpu.memory_space<vmem>>, vector<1x49x128xf32>
    %218 = vector.shape_cast %217 : vector<1x49x128xf32> to vector<49x128xf32>
    %219 = vector.broadcast %189 : f32 to vector<49x128xf32>
    %220 = arith.mulf %219, %218 : vector<49x128xf32>
    %221 = arith.addf %216, %220 : vector<49x128xf32>
    %c4_128 = arith.constant 4 : index
    %c0_129 = arith.constant 0 : index
    %c0_130 = arith.constant 0 : index
    %222 = vector.load %arg2[%c4_128, %c0_129, %c0_130] : memref<9x49x128xf32, #tpu.memory_space<vmem>>, vector<1x49x128xf32>
    %223 = vector.shape_cast %222 : vector<1x49x128xf32> to vector<49x128xf32>
    %224 = vector.broadcast %190 : f32 to vector<49x128xf32>
    %225 = arith.mulf %224, %223 : vector<49x128xf32>
    %226 = arith.addf %221, %225 : vector<49x128xf32>
    %c5_131 = arith.constant 5 : index
    %c0_132 = arith.constant 0 : index
    %c0_133 = arith.constant 0 : index
    %227 = vector.load %arg2[%c5_131, %c0_132, %c0_133] : memref<9x49x128xf32, #tpu.memory_space<vmem>>, vector<1x49x128xf32>
    %228 = vector.shape_cast %227 : vector<1x49x128xf32> to vector<49x128xf32>
    %229 = vector.broadcast %191 : f32 to vector<49x128xf32>
    %230 = arith.mulf %229, %228 : vector<49x128xf32>
    %231 = arith.addf %226, %230 : vector<49x128xf32>
    %cst_134 = arith.constant 0.000000e+00 : f32
    %232 = vector.broadcast %cst_134 : f32 to vector<49x128xf32>
    %233 = arith.maximumf %231, %232 : vector<49x128xf32>
    %234 = arith.addf %212, %233 : vector<49x128xf32>
    %c3_135 = arith.constant 3 : index
    %c0_136 = arith.constant 0 : index
    %c0_137 = arith.constant 0 : index
    %235 = vector.load %arg2[%c3_135, %c0_136, %c0_137] : memref<9x49x128xf32, #tpu.memory_space<vmem>>, vector<1x49x128xf32>
    %236 = vector.shape_cast %235 : vector<1x49x128xf32> to vector<49x128xf32>
    %237 = vector.broadcast %188 : f32 to vector<49x128xf32>
    %238 = arith.mulf %237, %236 : vector<49x128xf32>
    %c4_138 = arith.constant 4 : index
    %c0_139 = arith.constant 0 : index
    %c0_140 = arith.constant 0 : index
    %239 = vector.load %arg2[%c4_138, %c0_139, %c0_140] : memref<9x49x128xf32, #tpu.memory_space<vmem>>, vector<1x49x128xf32>
    %240 = vector.shape_cast %239 : vector<1x49x128xf32> to vector<49x128xf32>
    %241 = vector.broadcast %189 : f32 to vector<49x128xf32>
    %242 = arith.mulf %241, %240 : vector<49x128xf32>
    %243 = arith.addf %238, %242 : vector<49x128xf32>
    %c6_141 = arith.constant 6 : index
    %c0_142 = arith.constant 0 : index
    %c0_143 = arith.constant 0 : index
    %244 = vector.load %arg2[%c6_141, %c0_142, %c0_143] : memref<9x49x128xf32, #tpu.memory_space<vmem>>, vector<1x49x128xf32>
    %245 = vector.shape_cast %244 : vector<1x49x128xf32> to vector<49x128xf32>
    %246 = vector.broadcast %190 : f32 to vector<49x128xf32>
    %247 = arith.mulf %246, %245 : vector<49x128xf32>
    %248 = arith.addf %243, %247 : vector<49x128xf32>
    %c7_144 = arith.constant 7 : index
    %c0_145 = arith.constant 0 : index
    %c0_146 = arith.constant 0 : index
    %249 = vector.load %arg2[%c7_144, %c0_145, %c0_146] : memref<9x49x128xf32, #tpu.memory_space<vmem>>, vector<1x49x128xf32>
    %250 = vector.shape_cast %249 : vector<1x49x128xf32> to vector<49x128xf32>
    %251 = vector.broadcast %191 : f32 to vector<49x128xf32>
    %252 = arith.mulf %251, %250 : vector<49x128xf32>
    %253 = arith.addf %248, %252 : vector<49x128xf32>
    %cst_147 = arith.constant 0.000000e+00 : f32
    %254 = vector.broadcast %cst_147 : f32 to vector<49x128xf32>
    %255 = arith.maximumf %253, %254 : vector<49x128xf32>
    %256 = arith.addf %234, %255 : vector<49x128xf32>
    %c4_148 = arith.constant 4 : index
    %c0_149 = arith.constant 0 : index
    %c0_150 = arith.constant 0 : index
    %257 = vector.load %arg2[%c4_148, %c0_149, %c0_150] : memref<9x49x128xf32, #tpu.memory_space<vmem>>, vector<1x49x128xf32>
    %258 = vector.shape_cast %257 : vector<1x49x128xf32> to vector<49x128xf32>
    %259 = vector.broadcast %188 : f32 to vector<49x128xf32>
    %260 = arith.mulf %259, %258 : vector<49x128xf32>
    %c5_151 = arith.constant 5 : index
    %c0_152 = arith.constant 0 : index
    %c0_153 = arith.constant 0 : index
    %261 = vector.load %arg2[%c5_151, %c0_152, %c0_153] : memref<9x49x128xf32, #tpu.memory_space<vmem>>, vector<1x49x128xf32>
    %262 = vector.shape_cast %261 : vector<1x49x128xf32> to vector<49x128xf32>
    %263 = vector.broadcast %189 : f32 to vector<49x128xf32>
    %264 = arith.mulf %263, %262 : vector<49x128xf32>
    %265 = arith.addf %260, %264 : vector<49x128xf32>
    %c7_154 = arith.constant 7 : index
    %c0_155 = arith.constant 0 : index
    %c0_156 = arith.constant 0 : index
    %266 = vector.load %arg2[%c7_154, %c0_155, %c0_156] : memref<9x49x128xf32, #tpu.memory_space<vmem>>, vector<1x49x128xf32>
    %267 = vector.shape_cast %266 : vector<1x49x128xf32> to vector<49x128xf32>
    %268 = vector.broadcast %190 : f32 to vector<49x128xf32>
    %269 = arith.mulf %268, %267 : vector<49x128xf32>
    %270 = arith.addf %265, %269 : vector<49x128xf32>
    %c8_157 = arith.constant 8 : index
    %c0_158 = arith.constant 0 : index
    %c0_159 = arith.constant 0 : index
    %271 = vector.load %arg2[%c8_157, %c0_158, %c0_159] : memref<9x49x128xf32, #tpu.memory_space<vmem>>, vector<1x49x128xf32>
    %272 = vector.shape_cast %271 : vector<1x49x128xf32> to vector<49x128xf32>
    %273 = vector.broadcast %191 : f32 to vector<49x128xf32>
    %274 = arith.mulf %273, %272 : vector<49x128xf32>
    %275 = arith.addf %270, %274 : vector<49x128xf32>
    %cst_160 = arith.constant 0.000000e+00 : f32
    %276 = vector.broadcast %cst_160 : f32 to vector<49x128xf32>
    %277 = arith.maximumf %275, %276 : vector<49x128xf32>
    %278 = arith.addf %256, %277 : vector<49x128xf32>
    %c2_161 = arith.constant 2 : index
    %c0_162 = arith.constant 0 : index
    %c0_163 = arith.constant 0 : index
    %279 = vector.load %arg3[%c2_161, %c0_162, %c0_163] : memref<4x49x128xf32, #tpu.memory_space<vmem>>, vector<1x49x128xf32>
    %280 = vector.shape_cast %279 : vector<1x49x128xf32> to vector<49x128xf32>
    %281 = vector.shape_cast %278 : vector<49x128xf32> to vector<1x49x128xf32>
    tpu.vector_store %arg3[%c2_161, %c0_162, %c0_163], %281 {strides = array<i32>} : memref<4x49x128xf32, #tpu.memory_space<vmem>>, vector<1x49x128xf32>,
    %c12 = arith.constant 12 : index
    %282 = memref.load %arg1[%c12] : memref<16xf32, #tpu.memory_space<smem>>
    %c13 = arith.constant 13 : index
    %283 = memref.load %arg1[%c13] : memref<16xf32, #tpu.memory_space<smem>>
    %c14 = arith.constant 14 : index
    %284 = memref.load %arg1[%c14] : memref<16xf32, #tpu.memory_space<smem>>
    %c15 = arith.constant 15 : index
    %285 = memref.load %arg1[%c15] : memref<16xf32, #tpu.memory_space<smem>>
    %c0_164 = arith.constant 0 : index
    %c0_165 = arith.constant 0 : index
    %c0_166 = arith.constant 0 : index
    %286 = vector.load %arg2[%c0_164, %c0_165, %c0_166] : memref<9x49x128xf32, #tpu.memory_space<vmem>>, vector<1x49x128xf32>
    %287 = vector.shape_cast %286 : vector<1x49x128xf32> to vector<49x128xf32>
    %288 = vector.broadcast %282 : f32 to vector<49x128xf32>
    %289 = arith.mulf %288, %287 : vector<49x128xf32>
    %c1_167 = arith.constant 1 : index
    %c0_168 = arith.constant 0 : index
    %c0_169 = arith.constant 0 : index
    %290 = vector.load %arg2[%c1_167, %c0_168, %c0_169] : memref<9x49x128xf32, #tpu.memory_space<vmem>>, vector<1x49x128xf32>
    %291 = vector.shape_cast %290 : vector<1x49x128xf32> to vector<49x128xf32>
    %292 = vector.broadcast %283 : f32 to vector<49x128xf32>
    %293 = arith.mulf %292, %291 : vector<49x128xf32>
    %294 = arith.addf %289, %293 : vector<49x128xf32>
    %c3_170 = arith.constant 3 : index
    %c0_171 = arith.constant 0 : index
    %c0_172 = arith.constant 0 : index
    %295 = vector.load %arg2[%c3_170, %c0_171, %c0_172] : memref<9x49x128xf32, #tpu.memory_space<vmem>>, vector<1x49x128xf32>
    %296 = vector.shape_cast %295 : vector<1x49x128xf32> to vector<49x128xf32>
    %297 = vector.broadcast %284 : f32 to vector<49x128xf32>
    %298 = arith.mulf %297, %296 : vector<49x128xf32>
    %299 = arith.addf %294, %298 : vector<49x128xf32>
    %c4_173 = arith.constant 4 : index
    %c0_174 = arith.constant 0 : index
    %c0_175 = arith.constant 0 : index
    %300 = vector.load %arg2[%c4_173, %c0_174, %c0_175] : memref<9x49x128xf32, #tpu.memory_space<vmem>>, vector<1x49x128xf32>
    %301 = vector.shape_cast %300 : vector<1x49x128xf32> to vector<49x128xf32>
    %302 = vector.broadcast %285 : f32 to vector<49x128xf32>
    %303 = arith.mulf %302, %301 : vector<49x128xf32>
    %304 = arith.addf %299, %303 : vector<49x128xf32>
    %cst_176 = arith.constant 0.000000e+00 : f32
    %305 = vector.broadcast %cst_176 : f32 to vector<49x128xf32>
    %306 = arith.maximumf %304, %305 : vector<49x128xf32>
    %c1_177 = arith.constant 1 : index
    %c0_178 = arith.constant 0 : index
    %c0_179 = arith.constant 0 : index
    %307 = vector.load %arg2[%c1_177, %c0_178, %c0_179] : memref<9x49x128xf32, #tpu.memory_space<vmem>>, vector<1x49x128xf32>
    %308 = vector.shape_cast %307 : vector<1x49x128xf32> to vector<49x128xf32>
    %309 = vector.broadcast %282 : f32 to vector<49x128xf32>
    %310 = arith.mulf %309, %308 : vector<49x128xf32>
    %c2_180 = arith.constant 2 : index
    %c0_181 = arith.constant 0 : index
    %c0_182 = arith.constant 0 : index
    %311 = vector.load %arg2[%c2_180, %c0_181, %c0_182] : memref<9x49x128xf32, #tpu.memory_space<vmem>>, vector<1x49x128xf32>
    %312 = vector.shape_cast %311 : vector<1x49x128xf32> to vector<49x128xf32>
    %313 = vector.broadcast %283 : f32 to vector<49x128xf32>
    %314 = arith.mulf %313, %312 : vector<49x128xf32>
    %315 = arith.addf %310, %314 : vector<49x128xf32>
    %c4_183 = arith.constant 4 : index
    %c0_184 = arith.constant 0 : index
    %c0_185 = arith.constant 0 : index
    %316 = vector.load %arg2[%c4_183, %c0_184, %c0_185] : memref<9x49x128xf32, #tpu.memory_space<vmem>>, vector<1x49x128xf32>
    %317 = vector.shape_cast %316 : vector<1x49x128xf32> to vector<49x128xf32>
    %318 = vector.broadcast %284 : f32 to vector<49x128xf32>
    %319 = arith.mulf %318, %317 : vector<49x128xf32>
    %320 = arith.addf %315, %319 : vector<49x128xf32>
    %c5_186 = arith.constant 5 : index
    %c0_187 = arith.constant 0 : index
    %c0_188 = arith.constant 0 : index
    %321 = vector.load %arg2[%c5_186, %c0_187, %c0_188] : memref<9x49x128xf32, #tpu.memory_space<vmem>>, vector<1x49x128xf32>
    %322 = vector.shape_cast %321 : vector<1x49x128xf32> to vector<49x128xf32>
    %323 = vector.broadcast %285 : f32 to vector<49x128xf32>
    %324 = arith.mulf %323, %322 : vector<49x128xf32>
    %325 = arith.addf %320, %324 : vector<49x128xf32>
    %cst_189 = arith.constant 0.000000e+00 : f32
    %326 = vector.broadcast %cst_189 : f32 to vector<49x128xf32>
    %327 = arith.maximumf %325, %326 : vector<49x128xf32>
    %328 = arith.addf %306, %327 : vector<49x128xf32>
    %c3_190 = arith.constant 3 : index
    %c0_191 = arith.constant 0 : index
    %c0_192 = arith.constant 0 : index
    %329 = vector.load %arg2[%c3_190, %c0_191, %c0_192] : memref<9x49x128xf32, #tpu.memory_space<vmem>>, vector<1x49x128xf32>
    %330 = vector.shape_cast %329 : vector<1x49x128xf32> to vector<49x128xf32>
    %331 = vector.broadcast %282 : f32 to vector<49x128xf32>
    %332 = arith.mulf %331, %330 : vector<49x128xf32>
    %c4_193 = arith.constant 4 : index
    %c0_194 = arith.constant 0 : index
    %c0_195 = arith.constant 0 : index
    %333 = vector.load %arg2[%c4_193, %c0_194, %c0_195] : memref<9x49x128xf32, #tpu.memory_space<vmem>>, vector<1x49x128xf32>
    %334 = vector.shape_cast %333 : vector<1x49x128xf32> to vector<49x128xf32>
    %335 = vector.broadcast %283 : f32 to vector<49x128xf32>
    %336 = arith.mulf %335, %334 : vector<49x128xf32>
    %337 = arith.addf %332, %336 : vector<49x128xf32>
    %c6_196 = arith.constant 6 : index
    %c0_197 = arith.constant 0 : index
    %c0_198 = arith.constant 0 : index
    %338 = vector.load %arg2[%c6_196, %c0_197, %c0_198] : memref<9x49x128xf32, #tpu.memory_space<vmem>>, vector<1x49x128xf32>
    %339 = vector.shape_cast %338 : vector<1x49x128xf32> to vector<49x128xf32>
    %340 = vector.broadcast %284 : f32 to vector<49x128xf32>
    %341 = arith.mulf %340, %339 : vector<49x128xf32>
    %342 = arith.addf %337, %341 : vector<49x128xf32>
    %c7_199 = arith.constant 7 : index
    %c0_200 = arith.constant 0 : index
    %c0_201 = arith.constant 0 : index
    %343 = vector.load %arg2[%c7_199, %c0_200, %c0_201] : memref<9x49x128xf32, #tpu.memory_space<vmem>>, vector<1x49x128xf32>
    %344 = vector.shape_cast %343 : vector<1x49x128xf32> to vector<49x128xf32>
    %345 = vector.broadcast %285 : f32 to vector<49x128xf32>
    %346 = arith.mulf %345, %344 : vector<49x128xf32>
    %347 = arith.addf %342, %346 : vector<49x128xf32>
    %cst_202 = arith.constant 0.000000e+00 : f32
    %348 = vector.broadcast %cst_202 : f32 to vector<49x128xf32>
    %349 = arith.maximumf %347, %348 : vector<49x128xf32>
    %350 = arith.addf %328, %349 : vector<49x128xf32>
    %c4_203 = arith.constant 4 : index
    %c0_204 = arith.constant 0 : index
    %c0_205 = arith.constant 0 : index
    %351 = vector.load %arg2[%c4_203, %c0_204, %c0_205] : memref<9x49x128xf32, #tpu.memory_space<vmem>>, vector<1x49x128xf32>
    %352 = vector.shape_cast %351 : vector<1x49x128xf32> to vector<49x128xf32>
    %353 = vector.broadcast %282 : f32 to vector<49x128xf32>
    %354 = arith.mulf %353, %352 : vector<49x128xf32>
    %c5_206 = arith.constant 5 : index
    %c0_207 = arith.constant 0 : index
    %c0_208 = arith.constant 0 : index
    %355 = vector.load %arg2[%c5_206, %c0_207, %c0_208] : memref<9x49x128xf32, #tpu.memory_space<vmem>>, vector<1x49x128xf32>
    %356 = vector.shape_cast %355 : vector<1x49x128xf32> to vector<49x128xf32>
    %357 = vector.broadcast %283 : f32 to vector<49x128xf32>
    %358 = arith.mulf %357, %356 : vector<49x128xf32>
    %359 = arith.addf %354, %358 : vector<49x128xf32>
    %c7_209 = arith.constant 7 : index
    %c0_210 = arith.constant 0 : index
    %c0_211 = arith.constant 0 : index
    %360 = vector.load %arg2[%c7_209, %c0_210, %c0_211] : memref<9x49x128xf32, #tpu.memory_space<vmem>>, vector<1x49x128xf32>
    %361 = vector.shape_cast %360 : vector<1x49x128xf32> to vector<49x128xf32>
    %362 = vector.broadcast %284 : f32 to vector<49x128xf32>
    %363 = arith.mulf %362, %361 : vector<49x128xf32>
    %364 = arith.addf %359, %363 : vector<49x128xf32>
    %c8_212 = arith.constant 8 : index
    %c0_213 = arith.constant 0 : index
    %c0_214 = arith.constant 0 : index
    %365 = vector.load %arg2[%c8_212, %c0_213, %c0_214] : memref<9x49x128xf32, #tpu.memory_space<vmem>>, vector<1x49x128xf32>
    %366 = vector.shape_cast %365 : vector<1x49x128xf32> to vector<49x128xf32>
    %367 = vector.broadcast %285 : f32 to vector<49x128xf32>
    %368 = arith.mulf %367, %366 : vector<49x128xf32>
    %369 = arith.addf %364, %368 : vector<49x128xf32>
    %cst_215 = arith.constant 0.000000e+00 : f32
    %370 = vector.broadcast %cst_215 : f32 to vector<49x128xf32>
    %371 = arith.maximumf %369, %370 : vector<49x128xf32>
    %372 = arith.addf %350, %371 : vector<49x128xf32>
    %c3_216 = arith.constant 3 : index
    %c0_217 = arith.constant 0 : index
    %c0_218 = arith.constant 0 : index
    %373 = vector.load %arg3[%c3_216, %c0_217, %c0_218] : memref<4x49x128xf32, #tpu.memory_space<vmem>>, vector<1x49x128xf32>
    %374 = vector.shape_cast %373 : vector<1x49x128xf32> to vector<49x128xf32>
    %375 = vector.shape_cast %372 : vector<49x128xf32> to vector<1x49x128xf32>
    tpu.vector_store %arg3[%c3_216, %c0_217, %c0_218], %375 {strides = array<i32>} : memref<4x49x128xf32, #tpu.memory_space<vmem>>, vector<1x49x128xf32>,
    return
  }
  func.func @transform_0(%arg0: i32) -> i32 {
    %c0_i32 = arith.constant 0 : i32
    %c0_i32_0 = arith.constant 0 : i32
    return %c0_i32 : i32
  }
  func.func @transform_1(%arg0: i32) -> (i32, i32, i32) {
    %c0_i32 = arith.constant 0 : i32
    %c0_i32_0 = arith.constant 0 : i32
    %c0_i32_1 = arith.constant 0 : i32
    return %c0_i32, %c0_i32_0, %arg0 : i32, i32, i32
  }
  func.func @transform_2(%arg0: i32) -> (i32, i32, i32) {
    %c0_i32 = arith.constant 0 : i32
    %c0_i32_0 = arith.constant 0 : i32
    %c0_i32_1 = arith.constant 0 : i32
    return %c0_i32, %c0_i32_0, %arg0 : i32, i32, i32
  }
}

</mosaic_0001>

<bundles_post_ra>
// kernel: tpu_custom_call.1
= control target key start
LH: loop header
LB: loop body
LE: loop exit
PB: predicated region body
PF: predicated region fallthrough
CT: control target
= control target key end

     0   :  { %7 = vsyncpa [#allocation4], 0  ;;  %s2664_s0 = inlined_call_operand.hbm [shape: f32[16], index: 0, kind: input, shape index: {}]   ;;  %s2665_s1 = inlined_call_operand.hbm [shape: f32[9,49,128], index: 1, kind: input, shape index: {}]   ;;  %s2666_s2 = inlined_call_operand.vmem [shape: f32[4,49,128], index: 2, kind: output, shape index: {}]  }
   0x1   :  { %8 = vsyncpa [#allocation3], 0  ;;  %s1385_s11 = scalar_lea.hbm %s2664_s0, 16 }
   0x2   :  { %p1386_p0 = scmp.ne.s32.totalorder %s2664_s0, %s1385_s11  ;;  %p1389_p1 = scmp.lt.u32.totalorder %s1385_s11, %s2664_s0 }
   0x4   :  { %p1391_p2 = pnand %p1389_p1, %p1386_p0 }
   0x6   :  { %1394 = shalt.err (!%p1391_p2)
}
   0x7   :  { %s1421_s16 = smov [#allocation2]   ;;  %s1422_s19 = smov [#allocation5]  }
   0x8   :  { %16 = dma.hbm_to_smem %s2664_s0, 16, %s1421_s16, [#allocation4]  }
   0x9   :  { %s22_s20 = sshll.u32 %s1422_s19, 4  ;;  %s1395_s23 = scalar_lea.hbm %s2665_s1, 8064  ;;  %s23_s20 = int_to_ptr.vmem [resolvable:$true] %s22_s20 }
   0xa   :  { %p1396_p3 = scmp.ne.s32.totalorder %s2665_s1, %s1395_s23  ;;  %p1399_p4 = scmp.lt.u32.totalorder %s1395_s23, %s2665_s1 }
   0xc   :  { %p1401_p5 = pnand %p1399_p4, %p1396_p3 }
   0xe   :  { %1404 = shalt.err (!%p1401_p5)
}
   0xf   :  { %s1405_s28 = scalar_lea.vmem %s23_s20, 8064  ;;  %p1410_p7 = scmp.lt.s32.totalorder %s23_s20, %s23_s20 }
  0x10   :  { %p1406_p6 = scmp.ne.s32.totalorder %s23_s20, %s1405_s28  ;;  %p1411_p8 = scmp.lt.s32.totalorder %s1405_s28, %s1405_s28 }
  0x12   :  { %p1412_p9 = por %p1411_p8, %p1410_p7 }
  0x14   :  { %p1413_p10 = pnand %p1412_p9, %p1406_p6 }
  0x16   :  { %1416 = shalt.err (!%p1413_p10)
}
  0x17   :  { %s1423_s0 = smov 128   ;;  %s1424_s29 = smov 8  }
  0x18   :  { %28 = dma.hbm_to_vmem [thread:$0]  %s2665_s1, 8064, %s23_s20, [#allocation3], %s1423_s0, %s1423_s0, %s1424_s29  }
  0x19   :  { %1417 = dma.done.wait [#allocation4], 16  }
  0x1a   :  { %1418 = vsyncadd [#allocation4], 4294967280 }
  0x1b   :  { %1419 = dma.done.wait [#allocation3], 8064  }
  0x1c   :  { %1420 = vsyncadd [#allocation3], 4294959232 }
  0x1d   :  { %35 = sfence }
  0x1e   :  { %s36_s4 = sld [smem:[#allocation2]]  ;;  %s1345_s5 = sld [smem:[#allocation2 + $0x1]]  ;;  %v1464_v0 = vld [vmem:[#allocation5] sm:$0xff]  ;;  %v1466_v1 = vld [vmem:[#allocation5 + $0x38] sm:$0xff]  ;;  %v1468_v2 = vld [vmem:[#allocation5 + $0xa8] sm:$0xff] }
  0x1f   :  { %s1346_s6 = sld [smem:[#allocation2 + $0x2]]  ;;  %s1347_s7 = sld [smem:[#allocation2 + $0x3]]  ;;  %v1470_v3 = vld [vmem:[#allocation5 + $0x70] sm:$0xff]  ;;  %v1476_v6 = vld [vmem:[#allocation5 + $0xe0] sm:$0xff]  ;;  %v1478_v7 = vld [vmem:[#allocation5 + $0x118] sm:$0xff] }
  0x20   :  { %v1488_v12 = vld [vmem:[#allocation5 + $0x150] sm:$0xff]  ;;  %v1490_v13 = vld [vmem:[#allocation5 + $0x188] sm:$0xff]  ;;  %v1506_v22 = vld [vmem:[#allocation5 + $0x1c0] sm:$0xff]  ;;  %s1785_s15 = sld [smem:[#allocation2 + $0x4]]  ;;  %s1790_s16 = sld [smem:[#allocation2 + $0x5]] }
  0x21   :  { %v1508_v23 = vld [vmem:[#allocation5 + $0x8] sm:$0xff]  ;;  %v1516_v28 = vld [vmem:[#allocation5 + $0x40] sm:$0xff]  ;;  %v1518_v29 = vld [vmem:[#allocation5 + $0xb0] sm:$0xff]  ;;  %s1792_s17 = sld [smem:[#allocation2 + $0x6]]  ;;  %s1799_s20 = sld [smem:[#allocation2 + $0x7]] }
  0x22   :  { %v1530_v38 = vld [vmem:[#allocation5 + $0x78] sm:$0xff]  ;;  %v1536_v43 = vld [vmem:[#allocation5 + $0xe8] sm:$0xff]  ;;  %v1538_v44 = vld [vmem:[#allocation5 + $0x120] sm:$0xff]  ;;  %s2046_s1 = sld [smem:[#allocation2 + $0xa]]  ;;  %s2051_s8 = sld [smem:[#allocation2 + $0xb]] }
  0x23   :  { %v1546_v53 = vld [vmem:[#allocation5 + $0x158] sm:$0xff]  ;;  %v1552_v58 = vld [vmem:[#allocation5 + $0x190] sm:$0xff]  ;;  %s2393_s21 = sld [smem:[#allocation2 + $0xc]]  ;;  %s2401_s24 = sld [smem:[#allocation2 + $0xd]] }
  0x24   :  { %v1472_v4 = vstv %s36_s4  ;;  %v1474_v5 = vstv %s1345_s5  ;;  %s2034_s4 = sld [smem:[#allocation2 + $0x8]]  ;;  %s2403_s25 = sld [smem:[#allocation2 + $0xe]] }
  0x25   :  { %v48_v8 = vmul.f32 %v1472_v4, %v1464_v0  ;;  %v64_v9 = vmul.f32 %v1474_v5, %v1466_v1  ;;  %v1484_v10 = vstv %s1346_s6  ;;  %v1486_v11 = vstv %s1347_s7  ;;  %s2044_s7 = sld [smem:[#allocation2 + $0x9]]  ;;  %s2406_s26 = sld [smem:[#allocation2 + $0xf]] }
  0x26   :  { %v87_v14 = vmul.f32 %v1484_v10, %v1468_v2  ;;  %v110_v15 = vmul.f32 %v1486_v11, %v1476_v6  ;;  %v131_v16 = vmul.f32 %v1466_v1, %v1472_v4  ;;  %v146_v17 = vmul.f32 %v1470_v3, %v1474_v5 }
  0x27   :  { %v71_v18 = vadd.f32 %v64_v9, %v48_v8  ;;  %v160_v19 = vmul.f32 %v1476_v6, %v1484_v10  ;;  %v182_v20 = vmul.f32 %v1478_v7, %v1486_v11  ;;  %v210_v21 = vmul.f32 %v1468_v2, %v1472_v4 }
  0x28   :  { %v153_v24 = vadd.f32 %v146_v17, %v131_v16  ;;  %v217_v25 = vmul.f32 %v1476_v6, %v1474_v5  ;;  %v239_v26 = vmul.f32 %v1488_v12, %v1484_v10  ;;  %v261_v27 = vmul.f32 %v1490_v13, %v1486_v11 }
  0x29   :  { %v94_v30 = vadd.f32 %v87_v14, %v71_v18  ;;  %v289_v31 = vmul.f32 %v1476_v6, %v1472_v4  ;;  %v296_v32 = vmul.f32 %v1478_v7, %v1474_v5  ;;  %v310_v33 = vmul.f32 %v1490_v13, %v1484_v10 }
  0x2a   :  { %v167_v34 = vadd.f32 %v160_v19, %v153_v24  ;;  %v224_v35 = vadd.f32 %v217_v25, %v210_v21  ;;  %v332_v36 = vmul.f32 %v1506_v22, %v1486_v11  ;;  %v49_v37 = vmul.f32 %v1472_v4, %v1508_v23 }
  0x2b   :  { %v117_v39 = vadd.f32 %v110_v15, %v94_v30  ;;  %v303_v40 = vadd.f32 %v296_v32, %v289_v31  ;;  %v65_v41 = vmul.f32 %v1474_v5, %v1516_v28  ;;  %v88_v42 = vmul.f32 %v1484_v10, %v1518_v29  ;;  %v1560_v15 = vld [vmem:[#allocation5 + $0x1c8] sm:$0xff]  ;;  %v1572_v30 = vld [vmem:[#allocation5 + $0xb8] sm:$0xff] }
  0x2c   :  { %v189_v45 = vadd.f32 %v182_v20, %v167_v34  ;;  %v246_v46 = vadd.f32 %v239_v26, %v224_v35  ;;  %v111_v47 = vmul.f32 %v1486_v11, %v1536_v43  ;;  %v132_v48 = vmul.f32 %v1516_v28, %v1472_v4  ;;  %v1564_v20 = vld [vmem:[#allocation5 + $0x10] sm:$0xff]  ;;  %v1578_v35 = vld [vmem:[#allocation5 + $0x80] sm:$0xff] }
  0x2d   :  { %v124_v49 = vmax.f32 %v117_v39, 0.0  ;;  %v317_v50 = vadd.f32 %v310_v33, %v303_v40  ;;  %v72_v51 = vadd.f32 %v65_v41, %v49_v37  ;;  %v147_v52 = vmul.f32 %v1530_v38, %v1474_v5  ;;  %v1582_v41 = vld [vmem:[#allocation5 + $0xf0] sm:$0xff] }
  0x2e   :  { %v196_v54 = vmax.f32 %v189_v45, 0.0  ;;  %v268_v55 = vadd.f32 %v261_v27, %v246_v46  ;;  %v161_v56 = vmul.f32 %v1536_v43, %v1484_v10  ;;  %v183_v57 = vmul.f32 %v1538_v44, %v1486_v11  ;;  %v1570_v27 = vld [vmem:[#allocation5 + $0x48] sm:$0xff] }
  0x2f   :  { %v339_v59 = vadd.f32 %v332_v36, %v317_v50  ;;  %v95_v60 = vadd.f32 %v88_v42, %v72_v51  ;;  %v154_v61 = vadd.f32 %v147_v52, %v132_v48  ;;  %v211_v62 = vmul.f32 %v1518_v29, %v1472_v4  ;;  %v1584_v42 = vld [vmem:[#allocation5 + $0x128] sm:$0xff] }
  0x30   :  { %v203_v63 = vadd.f32 %v196_v54, %v124_v49  ;;  %v275_v8 = vmax.f32 %v268_v55, 0.0  ;;  %v218_v9 = vmul.f32 %v1536_v43, %v1474_v5  ;;  %v240_v14 = vmul.f32 %v1546_v53, %v1484_v10  ;;  %v1599_v54 = vld [vmem:[#allocation5 + $0x160] sm:$0xff]  ;;  %v1601_v55 = vld [vmem:[#allocation5 + $0x198] sm:$0xff] }
  0x31   :  { %v346_v16 = vmax.f32 %v339_v59, 0.0  ;;  %v118_v17 = vadd.f32 %v111_v47, %v95_v60  ;;  %v168_v18 = vadd.f32 %v161_v56, %v154_v61  ;;  %v262_v19 = vmul.f32 %v1552_v58, %v1486_v11 }
  0x32   :  { %v282_v21 = vadd.f32 %v275_v8, %v203_v63  ;;  %v225_v24 = vadd.f32 %v218_v9, %v211_v62  ;;  %v290_v25 = vmul.f32 %v1536_v43, %v1472_v4  ;;  %v297_v26 = vmul.f32 %v1538_v44, %v1474_v5 }
  0x33   :  { %v125_v31 = vmax.f32 %v118_v17, 0.0  ;;  %v190_v32 = vadd.f32 %v183_v57, %v168_v18  ;;  %v311_v33 = vmul.f32 %v1552_v58, %v1484_v10  ;;  %v333_v34 = vmul.f32 %v1560_v15, %v1486_v11  ;;  %v1615_v18 = vld [vmem:[#allocation5 + $0x1d0] sm:$0xff] }
  0x34   :  { %v353_v36 = vadd.f32 %v346_v16, %v282_v21  ;;  %v247_v37 = vadd.f32 %v240_v14, %v225_v24  ;;  %v304_v39 = vadd.f32 %v297_v26, %v290_v25  ;;  %v50_v40 = vmul.f32 %v1472_v4, %v1564_v20 }
  0x35   :  { %v197_v45 = vmax.f32 %v190_v32, 0.0  ;;  %v66_v46 = vmul.f32 %v1474_v5, %v1570_v27  ;;  %v89_v47 = vmul.f32 %v1484_v10, %v1572_v30  ;;  %v112_v48 = vmul.f32 %v1486_v11, %v1582_v41 }
  0x36   :  { %360 = vst [vmem:[%s2666_s2] sm:$0xff] %v353_v36  ;;  %v269_v49 = vadd.f32 %v262_v19, %v247_v37  ;;  %v318_v50 = vadd.f32 %v311_v33, %v304_v39  ;;  %v133_v51 = vmul.f32 %v1570_v27, %v1472_v4  ;;  %v148_v52 = vmul.f32 %v1578_v35, %v1474_v5  ;;  %v1617_v19 = vld [vmem:[#allocation5 + $0x18] sm:$0xff]  ;;  %v1627_v37 = vld [vmem:[#allocation5 + $0xc0] sm:$0xff] }
  0x37   :  { %v204_v56 = vadd.f32 %v197_v45, %v125_v31  ;;  %v73_v57 = vadd.f32 %v66_v46, %v50_v40  ;;  %v162_v59 = vmul.f32 %v1582_v41, %v1484_v10  ;;  %v184_v60 = vmul.f32 %v1584_v42, %v1486_v11  ;;  %v1621_v31 = vld [vmem:[#allocation5 + $0x50] sm:$0xff] }
  0x38   :  { %v276_v61 = vmax.f32 %v269_v49, 0.0  ;;  %v340_v62 = vadd.f32 %v333_v34, %v318_v50  ;;  %v155_v63 = vadd.f32 %v148_v52, %v133_v51  ;;  %v212_v8 = vmul.f32 %v1572_v30, %v1472_v4  ;;  %v1637_v52 = vld [vmem:[#allocation5 + $0xf8] sm:$0xff] }
  0x39   :  { %v96_v9 = vadd.f32 %v89_v47, %v73_v57  ;;  %v219_v14 = vmul.f32 %v1582_v41, %v1474_v5  ;;  %v241_v16 = vmul.f32 %v1599_v54, %v1484_v10  ;;  %v263_v17 = vmul.f32 %v1601_v55, %v1486_v11  ;;  %v1633_v47 = vld [vmem:[#allocation5 + $0x88] sm:$0xff]  ;;  %2742 = vst [vmem:[#allocation9_spill] sm:$0xff] %v1637_v52 }
  0x3a   :  { %v283_v21 = vadd.f32 %v276_v61, %v204_v56  ;;  %v347_v24 = vmax.f32 %v340_v62, 0.0  ;;  %v169_v25 = vadd.f32 %v162_v59, %v155_v63  ;;  %v291_v26 = vmul.f32 %v1582_v41, %v1472_v4  ;;  %2741 = vst [vmem:[#allocation8_spill] sm:$0xff] %v1633_v47  ;;  %v1639_v56 = vld [vmem:[#allocation5 + $0x130] sm:$0xff] }
  0x3b   :  { %v119_v32 = vadd.f32 %v112_v48, %v96_v9  ;;  %v226_v33 = vadd.f32 %v219_v14, %v212_v8  ;;  %v298_v34 = vmul.f32 %v1584_v42, %v1474_v5  ;;  %v312_v36 = vmul.f32 %v1601_v55, %v1484_v10  ;;  %2743 = vst [vmem:[#allocation10_spill] sm:$0xff] %v1639_v56  ;;  %v1652_v14 = vld [vmem:[#allocation5 + $0x168] sm:$0xff] }
  0x3c   :  { %v354_v39 = vadd.f32 %v347_v24, %v283_v21  ;;  %v191_v40 = vadd.f32 %v184_v60, %v169_v25  ;;  %v334_v45 = vmul.f32 %v1615_v18, %v1486_v11  ;;  %v51_v46 = vmul.f32 %v1472_v4, %v1617_v19  ;;  %2744 = vst [vmem:[#allocation11_spill] sm:$0xff] %v1652_v14 }
  0x3d   :  { %v126_v48 = vmax.f32 %v119_v32, 0.0  ;;  %v248_v49 = vadd.f32 %v241_v16, %v226_v33  ;;  %v305_v50 = vadd.f32 %v298_v34, %v291_v26  ;;  %v67_v51 = vmul.f32 %v1474_v5, %v1621_v31  ;;  %v1654_v16 = vld [vmem:[#allocation5 + $0x1a0] sm:$0xff] }
  0x3e   :  { %361 = vst [vmem:[%s2666_s2 + $0x8] sm:$0xff] %v354_v39  ;;  %v198_v57 = vmax.f32 %v191_v40, 0.0  ;;  %v90_v59 = vmul.f32 %v1484_v10, %v1627_v37  ;;  %v113_v60 = vmul.f32 %v1486_v11, %v1637_v52  ;;  %v134_v61 = vmul.f32 %v1621_v31, %v1472_v4  ;;  %2745 = vst [vmem:[#allocation12_spill] sm:$0xff] %v1654_v16 }
  0x3f   :  { %v270_v62 = vadd.f32 %v263_v17, %v248_v49  ;;  %v319_v63 = vadd.f32 %v312_v36, %v305_v50  ;;  %v74_v8 = vadd.f32 %v67_v51, %v51_v46  ;;  %v149_v9 = vmul.f32 %v1633_v47, %v1474_v5  ;;  %v1662_v36 = vld [vmem:[#allocation5 + $0x1d8] sm:$0xff]  ;;  %v1672_v49 = vld [vmem:[#allocation5 + $0x20] sm:$0xff] }
  0x40   :  { %v205_v21 = vadd.f32 %v198_v57, %v126_v48  ;;  %v163_v24 = vmul.f32 %v1637_v52, %v1484_v10  ;;  %v185_v25 = vmul.f32 %v1639_v56, %v1486_v11  ;;  %v213_v26 = vmul.f32 %v1627_v37, %v1472_v4  ;;  %2746 = vst [vmem:[#allocation13_spill] sm:$0xff] %v1662_v36 }
  0x41   :  { %v277_v17 = vmax.f32 %v270_v62, 0.0  ;;  %v341_v32 = vadd.f32 %v334_v45, %v319_v63  ;;  %v97_v33 = vadd.f32 %v90_v59, %v74_v8  ;;  %v156_v34 = vadd.f32 %v149_v9, %v134_v61  ;;  %2747 = vst [vmem:[#allocation14_spill] sm:$0xff] %v1672_v49  ;;  %v1674_v59 = vld [vmem:[#allocation5 + $0x58] sm:$0xff]  ;;  %v1676_v61 = vld [vmem:[#allocation5 + $0xc8] sm:$0xff] }
  0x42   :  { %v220_v39 = vmul.f32 %v1637_v52, %v1474_v5  ;;  %v242_v40 = vmul.f32 %v1652_v14, %v1484_v10  ;;  %v264_v46 = vmul.f32 %v1654_v16, %v1486_v11  ;;  %v292_v48 = vmul.f32 %v1637_v52, %v1472_v4  ;;  %2748 = vst [vmem:[#allocation15_spill] sm:$0xff] %v1674_v59  ;;  %v1684_v14 = vld [vmem:[#allocation5 + $0x90] sm:$0xff] }
  0x43   :  { %v284_v50 = vadd.f32 %v277_v17, %v205_v21  ;;  %v348_v45 = vmax.f32 %v341_v32, 0.0  ;;  %v120_v51 = vadd.f32 %v113_v60, %v97_v33  ;;  %v170_v57 = vadd.f32 %v163_v24, %v156_v34  ;;  %2749 = vst [vmem:[#allocation16_spill] sm:$0xff] %v1676_v61  ;;  %2750 = vst [vmem:[#allocation17_spill] sm:$0xff] %v1684_v14  ;;  %v1688_v32 = vld [vmem:[#allocation5 + $0x100] sm:$0xff] }
  0x44   :  { %v227_v62 = vadd.f32 %v220_v39, %v213_v26  ;;  %v299_v63 = vmul.f32 %v1639_v56, %v1474_v5  ;;  %v313_v8 = vmul.f32 %v1654_v16, %v1484_v10  ;;  %v335_v9 = vmul.f32 %v1662_v36, %v1486_v11  ;;  %2751 = vst [vmem:[#allocation18_spill] sm:$0xff] %v1688_v32  ;;  %v1694_v16 = vld [vmem:[#allocation5 + $0x138] sm:$0xff] }
  0x45   :  { %v355_v21 = vadd.f32 %v348_v45, %v284_v50  ;;  %v127_v17 = vmax.f32 %v120_v51, 0.0  ;;  %v192_v60 = vadd.f32 %v185_v25, %v170_v57  ;;  %v52_v24 = vmul.f32 %v1472_v4, %v1672_v49  ;;  %2752 = vst [vmem:[#allocation19_spill] sm:$0xff] %v1694_v16  ;;  %v1709_v49 = vld [vmem:[#allocation5 + $0x1a8] sm:$0xff] }
  0x46   :  { %v249_v26 = vadd.f32 %v242_v40, %v227_v62  ;;  %v306_v33 = vadd.f32 %v299_v63, %v292_v48  ;;  %v68_v34 = vmul.f32 %v1474_v5, %v1674_v59  ;;  %v91_v39 = vmul.f32 %v1484_v10, %v1676_v61  ;;  %v1707_v63 = vld [vmem:[#allocation5 + $0x170] sm:$0xff]  ;;  %2754 = vst [vmem:[#allocation21_spill] sm:$0xff] %v1709_v49 }
  0x47   :  { %362 = vst [vmem:[%s2666_s2 + $0x10] sm:$0xff] %v355_v21  ;;  %v199_v25 = vmax.f32 %v192_v60, 0.0  ;;  %v114_v50 = vmul.f32 %v1486_v11, %v1688_v32  ;;  %v135_v40 = vmul.f32 %v1674_v59, %v1472_v4  ;;  %v150_v48 = vmul.f32 %v1684_v14, %v1474_v5  ;;  %2753 = vst [vmem:[#allocation20_spill] sm:$0xff] %v1707_v63 }
  0x48   :  { %v271_v45 = vadd.f32 %v264_v46, %v249_v26  ;;  %v320_v51 = vadd.f32 %v313_v8, %v306_v33  ;;  %v75_v57 = vadd.f32 %v68_v34, %v52_v24  ;;  %v164_v62 = vmul.f32 %v1688_v32, %v1484_v10  ;;  %v1717_v24 = vld [vmem:[#allocation5 + $0x1e0] sm:$0xff] }
  0x49   :  { %v206_v21 = vadd.f32 %v199_v25, %v127_v17  ;;  %v157_v60 = vadd.f32 %v150_v48, %v135_v40  ;;  %v186_v36 = vmul.f32 %v1694_v16, %v1486_v11  ;;  %v214_v59 = vmul.f32 %v1676_v61, %v1472_v4  ;;  %2755 = vst [vmem:[#allocation22_spill] sm:$0xff] %v1717_v24  ;;  %v1725_v25 = vld [vmem:[#allocation5 + $0x28] sm:$0xff] }
  0x4a   :  { %v278_v56 = vmax.f32 %v271_v45, 0.0  ;;  %v342_v14 = vadd.f32 %v335_v9, %v320_v51  ;;  %v98_v46 = vadd.f32 %v91_v39, %v75_v57  ;;  %v221_v8 = vmul.f32 %v1688_v32, %v1474_v5  ;;  %2756 = vst [vmem:[#allocation23_spill] sm:$0xff] %v1725_v25  ;;  %v1727_v45 = vld [vmem:[#allocation5 + $0x60] sm:$0xff]  ;;  %v1729_v51 = vld [vmem:[#allocation5 + $0xd0] sm:$0xff] }
  0x4b   :  { %v171_v26 = vadd.f32 %v164_v62, %v157_v60  ;;  %v243_v33 = vmul.f32 %v1707_v63, %v1484_v10  ;;  %v265_v17 = vmul.f32 %v1709_v49, %v1486_v11  ;;  %v293_v34 = vmul.f32 %v1688_v32, %v1472_v4  ;;  %2757 = vst [vmem:[#allocation24_spill] sm:$0xff] %v1727_v45  ;;  %v1737_v32 = vld [vmem:[#allocation5 + $0x98] sm:$0xff] }
  0x4c   :  { %v285_v40 = vadd.f32 %v278_v56, %v206_v21  ;;  %v349_v9 = vmax.f32 %v342_v14, 0.0  ;;  %v121_v39 = vadd.f32 %v114_v50, %v98_v46  ;;  %v228_v48 = vadd.f32 %v221_v8, %v214_v59  ;;  %2758 = vst [vmem:[#allocation25_spill] sm:$0xff] %v1729_v51  ;;  %2759 = vst [vmem:[#allocation26_spill] sm:$0xff] %v1737_v32  ;;  %v1741_v21 = vld [vmem:[#allocation5 + $0x108] sm:$0xff] }
  0x4d   :  { %v193_v57 = vadd.f32 %v186_v36, %v171_v26  ;;  %v300_v62 = vmul.f32 %v1694_v16, %v1474_v5  ;;  %v314_v60 = vmul.f32 %v1709_v49, %v1484_v10  ;;  %v336_v63 = vmul.f32 %v1717_v24, %v1486_v11  ;;  %2760 = vst [vmem:[#allocation27_spill] sm:$0xff] %v1741_v21  ;;  %v1747_v49 = vld [vmem:[#allocation5 + $0x140] sm:$0xff]  ;;  %v1762_v24 = vld [vmem:[#allocation5 + $0x1b0] sm:$0xff] }
  0x4e   :  { %v356_v56 = vadd.f32 %v349_v9, %v285_v40  ;;  %v128_v14 = vmax.f32 %v121_v39, 0.0  ;;  %v250_v50 = vadd.f32 %v243_v33, %v228_v48  ;;  %v53_v59 = vmul.f32 %v1472_v4, %v1725_v25  ;;  %2761 = vst [vmem:[#allocation28_spill] sm:$0xff] %v1747_v49  ;;  %v1758_v39 = vld [vmem:[#allocation5 + $0x178] sm:$0xff]  ;;  %2763 = vst [vmem:[#allocation30_spill] sm:$0xff] %v1762_v24 }
  0x4f   :  { %v200_v36 = vmax.f32 %v193_v57, 0.0  ;;  %v307_v46 = vadd.f32 %v300_v62, %v293_v34  ;;  %v69_v8 = vmul.f32 %v1474_v5, %v1727_v45  ;;  %v92_v26 = vmul.f32 %v1484_v10, %v1729_v51  ;;  %2762 = vst [vmem:[#allocation29_spill] sm:$0xff] %v1758_v39 }
  0x50   :  { %363 = vst [vmem:[%s2666_s2 + $0x18] sm:$0xff] %v356_v56  ;;  %v272_v33 = vadd.f32 %v265_v17, %v250_v50  ;;  %v115_v40 = vmul.f32 %v1486_v11, %v1741_v21  ;;  %v136_v9 = vmul.f32 %v1727_v45, %v1472_v4  ;;  %v151_v34 = vmul.f32 %v1737_v32, %v1474_v5 }
  0x51   :  { %v207_v48 = vadd.f32 %v200_v36, %v128_v14  ;;  %v321_v57 = vadd.f32 %v314_v60, %v307_v46  ;;  %v76_v62 = vadd.f32 %v69_v8, %v53_v59  ;;  %v165_v25 = vmul.f32 %v1741_v21, %v1484_v10  ;;  %v1772_v59 = vld [vmem:[#allocation5 + $0x1e8] sm:$0xff]  ;;  %v46_v36 = vld [vmem:[#allocation5 + $0x30] sm:$0x1] }
  0x52   :  { %v279_v17 = vmax.f32 %v272_v33, 0.0  ;;  %v158_v56 = vadd.f32 %v151_v34, %v136_v9  ;;  %v187_v50 = vmul.f32 %v1747_v49, %v1486_v11  ;;  %v215_v45 = vmul.f32 %v1729_v51, %v1472_v4  ;;  %2764 = vst [vmem:[#allocation31_spill] sm:$0xff] %v1772_v59  ;;  %v85_v51 = vld [vmem:[#allocation5 + $0xd8] sm:$0x1] }
  0x53   :  { %v343_v16 = vadd.f32 %v336_v63, %v321_v57  ;;  %v99_v32 = vadd.f32 %v92_v26, %v76_v62  ;;  %v222_v14 = vmul.f32 %v1741_v21, %v1474_v5  ;;  %v244_v60 = vmul.f32 %v1758_v39, %v1484_v10  ;;  %v62_v62 = vld [vmem:[#allocation5 + $0x68] sm:$0x1] }
  0x54   :  { %v286_v46 = vadd.f32 %v279_v17, %v207_v48  ;;  %v172_v8 = vadd.f32 %v165_v25, %v158_v56  ;;  %v266_v33 = vmul.f32 %v1762_v24, %v1486_v11  ;;  %v294_v9 = vmul.f32 %v1741_v21, %v1472_v4  ;;  %v145_v17 = vld [vmem:[#allocation5 + $0xa0] sm:$0x1]  ;;  %v108_v56 = vld [vmem:[#allocation5 + $0x110] sm:$0x1] }
  0x55   :  { %v350_v34 = vmax.f32 %v343_v16, 0.0  ;;  %v122_v63 = vadd.f32 %v115_v40, %v99_v32  ;;  %v229_v26 = vadd.f32 %v222_v14, %v215_v45  ;;  %v301_v57 = vmul.f32 %v1747_v49, %v1474_v5  ;;  %v181_v14 = vld [vmem:[#allocation5 + $0x148] sm:$0x1] }
  0x56   :  { %v194_v39 = vadd.f32 %v187_v50, %v172_v8  ;;  %v315_v61 = vmul.f32 %v1762_v24, %v1484_v10  ;;  %v337_v25 = vmul.f32 %v1772_v59, %v1486_v11  ;;  %v54_v48 = vmul.f32 %v1472_v4, %v46_v36 }
  0x57   :  { %v357_v16 = vadd.f32 %v350_v34, %v286_v46  ;;  %v129_v32 = vmax.f32 %v122_v63, 0.0  ;;  %v251_v45 = vadd.f32 %v244_v60, %v229_v26  ;;  %v308_v40 = vadd.f32 %v301_v57, %v294_v9  ;;  %v238_v9 = vld [vmem:[#allocation5 + $0x180] sm:$0x1]  ;;  %v260_v34 = vld [vmem:[#allocation5 + $0x1b8] sm:$0x1] }
  0x58   :  { %v201_v49 = vmax.f32 %v194_v39, 0.0  ;;  %v70_v50 = vmul.f32 %v1474_v5, %v62_v62  ;;  %v93_v8 = vmul.f32 %v1484_v10, %v85_v51  ;;  %v116_v24 = vmul.f32 %v1486_v11, %v108_v56 }
  0x59   :  { %364 = vst [vmem:[%s2666_s2 + $0x20] sm:$0xff] %v357_v16  ;;  %v273_v36 = vadd.f32 %v266_v33, %v251_v45  ;;  %v322_v60 = vadd.f32 %v315_v61, %v308_v40  ;;  %v137_v46 = vmul.f32 %v62_v62, %v1472_v4  ;;  %v152_v39 = vmul.f32 %v145_v17, %v1474_v5  ;;  %v331_v45 = vld [vmem:[#allocation5 + $0x1f0] sm:$0x1] }
  0x5a   :  { %v208_v63 = vadd.f32 %v201_v49, %v129_v32  ;;  %v77_v26 = vadd.f32 %v70_v50, %v54_v48  ;;  %v166_v57 = vmul.f32 %v108_v56, %v1484_v10  ;;  %v188_v59 = vmul.f32 %v181_v14, %v1486_v11 }
  0x5b   :  { %v280_v21 = vmax.f32 %v273_v36, 0.0  ;;  %v344_v47 = vadd.f32 %v337_v25, %v322_v60  ;;  %v159_v52 = vadd.f32 %v152_v39, %v137_v46  ;;  %v216_v33 = vmul.f32 %v85_v51, %v1472_v4 }
  0x5c   :  { %v100_v61 = vadd.f32 %v93_v8, %v77_v26  ;;  %v223_v62 = vmul.f32 %v108_v56, %v1474_v5  ;;  %v245_v17 = vmul.f32 %v238_v9, %v1484_v10  ;;  %v267_v16 = vmul.f32 %v260_v34, %v1486_v11 }
  0x5d   :  { %v287_v49 = vadd.f32 %v280_v21, %v208_v63  ;;  %v351_v48 = vmax.f32 %v344_v47, 0.0  ;;  %v173_v32 = vadd.f32 %v166_v57, %v159_v52  ;;  %v295_v40 = vmul.f32 %v108_v56, %v1472_v4 }
  0x5e   :  { %v123_v25 = vadd.f32 %v116_v24, %v100_v61  ;;  %v230_v50 = vadd.f32 %v223_v62, %v216_v33  ;;  %v302_v51 = vmul.f32 %v181_v14, %v1474_v5  ;;  %v316_v8 = vmul.f32 %v260_v34, %v1484_v10 }
  0x5f   :  { %v358_v36 = vadd.f32 %v351_v48, %v287_v49  ;;  %v195_v60 = vadd.f32 %v188_v59, %v173_v32  ;;  %v338_v46 = vmul.f32 %v331_v45, %v1486_v11  ;;  %v1812_v39 = vstv %s1785_s15 }
  0x60   :  { %v130_v21 = vmax.f32 %v123_v25, 0.0  ;;  %v252_v47 = vadd.f32 %v245_v17, %v230_v50  ;;  %v309_v52 = vadd.f32 %v302_v51, %v295_v40  ;;  %v379_v4 = vmul.f32 %v1812_v39, %v1464_v0 }
  0x61   :  { %365 = vst [vmem:[%s2666_s2 + $0x28] sm:$0xff] %v358_v36  ;;  %v202_v24 = vmax.f32 %v195_v60, 0.0  ;;  %v1820_v5 = vstv %s1790_s16  ;;  %v1823_v10 = vstv %s1792_s17  ;;  %v1826_v59 = vstv %s1799_s20 }
  0x62   :  { %v274_v11 = vadd.f32 %v267_v16, %v252_v47  ;;  %v323_v56 = vadd.f32 %v316_v8, %v309_v52  ;;  %v394_v14 = vmul.f32 %v1820_v5, %v1466_v1  ;;  %v416_v9 = vmul.f32 %v1823_v10, %v1468_v2 }
  0x63   :  { %v209_v0 = vadd.f32 %v202_v24, %v130_v21  ;;  %v438_v34 = vmul.f32 %v1826_v59, %v1476_v6  ;;  %v459_v63 = vmul.f32 %v1812_v39, %v1466_v1  ;;  %v473_v26 = vmul.f32 %v1820_v5, %v1470_v3 }
  0x64   :  { %v281_v57 = vmax.f32 %v274_v11, 0.0  ;;  %v345_v33 = vadd.f32 %v338_v46, %v323_v56  ;;  %v401_v61 = vadd.f32 %v394_v14, %v379_v4  ;;  %v487_v62 = vmul.f32 %v1823_v10, %v1476_v6 }
  0x65   :  { %v480_v17 = vadd.f32 %v473_v26, %v459_v63  ;;  %v508_v16 = vmul.f32 %v1826_v59, %v1478_v7  ;;  %v536_v45 = vmul.f32 %v1812_v39, %v1468_v2  ;;  %v543_v49 = vmul.f32 %v1820_v5, %v1476_v6 }
  0x66   :  { %v288_v1 = vadd.f32 %v281_v57, %v209_v0  ;;  %v352_v48 = vmax.f32 %v345_v33, 0.0  ;;  %v423_v32 = vadd.f32 %v416_v9, %v401_v61  ;;  %v564_v3 = vmul.f32 %v1823_v10, %v1488_v12 }
  0x67   :  { %v494_v40 = vadd.f32 %v487_v62, %v480_v17  ;;  %v550_v25 = vadd.f32 %v543_v49, %v536_v45  ;;  %v585_v50 = vmul.f32 %v1826_v59, %v1490_v13  ;;  %v613_v51 = vmul.f32 %v1812_v39, %v1476_v6 }
  0x68   :  { %v359_v8 = vadd.f32 %v352_v48, %v288_v1  ;;  %v445_v36 = vadd.f32 %v438_v34, %v423_v32  ;;  %v620_v2 = vmul.f32 %v1820_v5, %v1478_v7  ;;  %v634_v60 = vmul.f32 %v1823_v10, %v1490_v13 }
  0x69   :  { %v515_v46 = vadd.f32 %v508_v16, %v494_v40  ;;  %v571_v21 = vadd.f32 %v564_v3, %v550_v25  ;;  %v655_v12 = vmul.f32 %v1826_v59, %v1506_v22  ;;  %v380_v47 = vmul.f32 %v1812_v39, %v1508_v23 }
  0x6a   :  { %366 = vst [vmem:[%s2666_s2 + $0x30] sm:$0x1] %v359_v8  ;;  %v452_v6 = vmax.f32 %v445_v36, 0.0  ;;  %v627_v52 = vadd.f32 %v620_v2, %v613_v51  ;;  %v395_v7 = vmul.f32 %v1820_v5, %v1516_v28  ;;  %v417_v13 = vmul.f32 %v1823_v10, %v1518_v29 }
  0x6b   :  { %v522_v4 = vmax.f32 %v515_v46, 0.0  ;;  %v592_v24 = vadd.f32 %v585_v50, %v571_v21  ;;  %v439_v22 = vmul.f32 %v1826_v59, %v1536_v43  ;;  %v460_v23 = vmul.f32 %v1812_v39, %v1516_v28 }
  0x6c   :  { %v641_v11 = vadd.f32 %v634_v60, %v627_v52  ;;  %v402_v56 = vadd.f32 %v395_v7, %v380_v47  ;;  %v474_v14 = vmul.f32 %v1820_v5, %v1530_v38  ;;  %v488_v9 = vmul.f32 %v1823_v10, %v1536_v43 }
  0x6d   :  { %v529_v0 = vadd.f32 %v522_v4, %v452_v6  ;;  %v599_v34 = vmax.f32 %v592_v24, 0.0  ;;  %v509_v63 = vmul.f32 %v1826_v59, %v1538_v44  ;;  %v537_v26 = vmul.f32 %v1812_v39, %v1518_v29 }
  0x6e   :  { %v662_v57 = vadd.f32 %v655_v12, %v641_v11  ;;  %v424_v33 = vadd.f32 %v417_v13, %v402_v56  ;;  %v481_v61 = vadd.f32 %v474_v14, %v460_v23  ;;  %v544_v28 = vmul.f32 %v1820_v5, %v1536_v43 }
  0x6f   :  { %v606_v62 = vadd.f32 %v599_v34, %v529_v0  ;;  %v565_v38 = vmul.f32 %v1823_v10, %v1546_v53  ;;  %v586_v17 = vmul.f32 %v1826_v59, %v1552_v58  ;;  %v614_v16 = vmul.f32 %v1812_v39, %v1536_v43 }
  0x70   :  { %v669_v45 = vmax.f32 %v662_v57, 0.0  ;;  %v446_v49 = vadd.f32 %v439_v22, %v424_v33  ;;  %v495_v1 = vadd.f32 %v488_v9, %v481_v61  ;;  %v551_v29 = vadd.f32 %v544_v28, %v537_v26 }
  0x71   :  { %v621_v48 = vmul.f32 %v1820_v5, %v1538_v44  ;;  %v635_v32 = vmul.f32 %v1823_v10, %v1552_v58  ;;  %v656_v3 = vmul.f32 %v1826_v59, %v1560_v15  ;;  %v381_v53 = vmul.f32 %v1812_v39, %v1564_v20 }
  0x72   :  { %v676_v40 = vadd.f32 %v669_v45, %v606_v62  ;;  %v453_v25 = vmax.f32 %v446_v49, 0.0  ;;  %v516_v50 = vadd.f32 %v509_v63, %v495_v1  ;;  %v572_v43 = vadd.f32 %v565_v38, %v551_v29  ;;  %v2765_v62 = vld [vmem:[#allocation9_spill] sm:$0xff]  ;;  %v2767_v29 = vld [vmem:[#allocation10_spill] sm:$0xff] }
  0x73   :  { %v628_v51 = vadd.f32 %v621_v48, %v614_v16  ;;  %v396_v8 = vmul.f32 %v1820_v5, %v1570_v27  ;;  %v418_v44 = vmul.f32 %v1823_v10, %v1572_v30  ;;  %v440_v58 = vmul.f32 %v1826_v59, %v1582_v41 }
  0x74   :  { %1352 = vst [vmem:[%s2666_s2 + $0x38] sm:$0xff] %v676_v40  ;;  %v523_v15 = vmax.f32 %v516_v50, 0.0  ;;  %v593_v20 = vadd.f32 %v586_v17, %v572_v43  ;;  %v461_v36 = vmul.f32 %v1812_v39, %v1570_v27  ;;  %v475_v2 = vmul.f32 %v1820_v5, %v1578_v35  ;;  %v2766_v17 = vld [vmem:[#allocation8_spill] sm:$0xff]  ;;  %v2768_v50 = vld [vmem:[#allocation11_spill] sm:$0xff] }
  0x75   :  { %v642_v60 = vadd.f32 %v635_v32, %v628_v51  ;;  %v403_v46 = vadd.f32 %v396_v8, %v381_v53  ;;  %v489_v21 = vmul.f32 %v1823_v10, %v1582_v41  ;;  %v510_v12 = vmul.f32 %v1826_v59, %v1584_v42  ;;  %v2769_v51 = vld [vmem:[#allocation12_spill] sm:$0xff] }
  0x76   :  { %v530_v47 = vadd.f32 %v523_v15, %v453_v25  ;;  %v600_v6 = vmax.f32 %v593_v20, 0.0  ;;  %v482_v52 = vadd.f32 %v475_v2, %v461_v36  ;;  %v538_v7 = vmul.f32 %v1812_v39, %v1572_v30 }
  0x77   :  { %v663_v13 = vadd.f32 %v656_v3, %v642_v60  ;;  %v425_v4 = vadd.f32 %v418_v44, %v403_v46  ;;  %v545_v27 = vmul.f32 %v1820_v5, %v1582_v41  ;;  %v566_v35 = vmul.f32 %v1823_v10, %v1599_v54 }
  0x78   :  { %v607_v24 = vadd.f32 %v600_v6, %v530_v47  ;;  %v496_v22 = vadd.f32 %v489_v21, %v482_v52  ;;  %v587_v23 = vmul.f32 %v1826_v59, %v1601_v55  ;;  %v615_v11 = vmul.f32 %v1812_v39, %v1582_v41  ;;  %v2771_v6 = vld [vmem:[#allocation14_spill] sm:$0xff] }
  0x79   :  { %v670_v56 = vmax.f32 %v663_v13, 0.0  ;;  %v447_v14 = vadd.f32 %v440_v58, %v425_v4  ;;  %v552_v9 = vadd.f32 %v545_v27, %v538_v7  ;;  %v622_v30 = vmul.f32 %v1820_v5, %v1584_v42  ;;  %v2772_v27 = vld [vmem:[#allocation15_spill] sm:$0xff] }
  0x7a   :  { %v517_v0 = vadd.f32 %v510_v12, %v496_v22  ;;  %v636_v34 = vmul.f32 %v1823_v10, %v1601_v55  ;;  %v657_v54 = vmul.f32 %v1826_v59, %v1615_v18  ;;  %v382_v63 = vmul.f32 %v1812_v39, %v1617_v19  ;;  %v2770_v12 = vld [vmem:[#allocation13_spill] sm:$0xff]  ;;  %v2773_v22 = vld [vmem:[#allocation16_spill] sm:$0xff] }
  0x7b   :  { %v677_v26 = vadd.f32 %v670_v56, %v607_v24  ;;  %v454_v57 = vmax.f32 %v447_v14, 0.0  ;;  %v573_v33 = vadd.f32 %v566_v35, %v552_v9  ;;  %v629_v41 = vadd.f32 %v622_v30, %v615_v11  ;;  %v2774_v11 = vld [vmem:[#allocation18_spill] sm:$0xff] }
  0x7c   :  { %v524_v61 = vmax.f32 %v517_v0, 0.0  ;;  %v397_v28 = vmul.f32 %v1820_v5, %v1621_v31  ;;  %v419_v42 = vmul.f32 %v1823_v10, %v1627_v37  ;;  %v441_v55 = vmul.f32 %v1826_v59, %v2765_v62 }
  0x7d   :  { %1353 = vst [vmem:[%s2666_s2 + $0x40] sm:$0xff] %v677_v26  ;;  %v594_v18 = vadd.f32 %v587_v23, %v573_v33  ;;  %v643_v19 = vadd.f32 %v636_v34, %v629_v41  ;;  %v462_v38 = vmul.f32 %v1812_v39, %v1621_v31  ;;  %v476_v16 = vmul.f32 %v1820_v5, %v2766_v17  ;;  %v2775_v34 = vld [vmem:[#allocation17_spill] sm:$0xff] }
  0x7e   :  { %v531_v45 = vadd.f32 %v524_v61, %v454_v57  ;;  %v404_v49 = vadd.f32 %v397_v28, %v382_v63  ;;  %v490_v1 = vmul.f32 %v1823_v10, %v2765_v62  ;;  %v511_v48 = vmul.f32 %v1826_v59, %v2767_v29  ;;  %v2776_v57 = vld [vmem:[#allocation19_spill] sm:$0xff] }
  0x7f   :  { %v601_v32 = vmax.f32 %v594_v18, 0.0  ;;  %v664_v3 = vadd.f32 %v657_v54, %v643_v19  ;;  %v483_v53 = vadd.f32 %v476_v16, %v462_v38  ;;  %v539_v40 = vmul.f32 %v1812_v39, %v1627_v37  ;;  %v2777_v18 = vld [vmem:[#allocation20_spill] sm:$0xff]  ;;  %v2778_v38 = vld [vmem:[#allocation21_spill] sm:$0xff] }
  0x80   :  { %v426_v25 = vadd.f32 %v419_v42, %v404_v49  ;;  %v546_v31 = vmul.f32 %v1820_v5, %v2765_v62  ;;  %v567_v43 = vmul.f32 %v1823_v10, %v2768_v50  ;;  %v588_v8 = vmul.f32 %v1826_v59, %v2769_v51 }
  0x81   :  { %v608_v44 = vadd.f32 %v601_v32, %v531_v45  ;;  %v671_v58 = vmax.f32 %v664_v3, 0.0  ;;  %v497_v15 = vadd.f32 %v490_v1, %v483_v53  ;;  %v616_v20 = vmul.f32 %v1812_v39, %v2765_v62  ;;  %v2779_v53 = vld [vmem:[#allocation22_spill] sm:$0xff] }
  0x82   :  { %v448_v36 = vadd.f32 %v441_v55, %v426_v25  ;;  %v553_v2 = vadd.f32 %v546_v31, %v539_v40  ;;  %v623_v37 = vmul.f32 %v1820_v5, %v2767_v29  ;;  %v637_v60 = vmul.f32 %v1823_v10, %v2769_v51 }
  0x83   :  { %v678_v46 = vadd.f32 %v671_v58, %v608_v44  ;;  %v518_v21 = vadd.f32 %v511_v48, %v497_v15  ;;  %v658_v47 = vmul.f32 %v1826_v59, %v2770_v12  ;;  %v383_v52 = vmul.f32 %v1812_v39, %v2771_v6  ;;  %v2781_v58 = vld [vmem:[#allocation24_spill] sm:$0xff] }
  0x84   :  { %v455_v7 = vmax.f32 %v448_v36, 0.0  ;;  %v574_v13 = vadd.f32 %v567_v43, %v553_v2  ;;  %v630_v4 = vadd.f32 %v623_v37, %v616_v20  ;;  %v398_v35 = vmul.f32 %v1820_v5, %v2772_v27  ;;  %v2780_v43 = vld [vmem:[#allocation23_spill] sm:$0xff]  ;;  %v2782_v20 = vld [vmem:[#allocation25_spill] sm:$0xff] }
  0x85   :  { %1354 = vst [vmem:[%s2666_s2 + $0x48] sm:$0xff] %v678_v46  ;;  %v525_v24 = vmax.f32 %v518_v21, 0.0  ;;  %v420_v23 = vmul.f32 %v1823_v10, %v2773_v22  ;;  %v442_v56 = vmul.f32 %v1826_v59, %v2774_v11  ;;  %v463_v14 = vmul.f32 %v1812_v39, %v2772_v27  ;;  %v2783_v37 = vld [vmem:[#allocation27_spill] sm:$0xff]  ;;  %v2784_v21 = vld [vmem:[#allocation26_spill] sm:$0xff]  ;;  %v2785_v27 = vld [vmem:[#allocation28_spill] sm:$0xff] }
  0x86   :  { %v595_v9 = vadd.f32 %v588_v8, %v574_v13  ;;  %v644_v30 = vadd.f32 %v637_v60, %v630_v4  ;;  %v405_v0 = vadd.f32 %v398_v35, %v383_v52  ;;  %v477_v54 = vmul.f32 %v1820_v5, %v2775_v34 }
  0x87   :  { %v532_v63 = vadd.f32 %v525_v24, %v455_v7  ;;  %v491_v26 = vmul.f32 %v1823_v10, %v2774_v11  ;;  %v512_v33 = vmul.f32 %v1826_v59, %v2776_v57  ;;  %v540_v41 = vmul.f32 %v1812_v39, %v2773_v22 }
  0x88   :  { %v602_v61 = vmax.f32 %v595_v9, 0.0  ;;  %v665_v28 = vadd.f32 %v658_v47, %v644_v30  ;;  %v427_v42 = vadd.f32 %v420_v23, %v405_v0  ;;  %v484_v62 = vadd.f32 %v477_v54, %v463_v14  ;;  %v2786_v9 = vld [vmem:[#allocation29_spill] sm:$0xff]  ;;  %v2787_v0 = vld [vmem:[#allocation30_spill] sm:$0xff] }
  0x89   :  { %v547_v55 = vmul.f32 %v1820_v5, %v2774_v11  ;;  %v568_v19 = vmul.f32 %v1823_v10, %v2777_v18  ;;  %v589_v17 = vmul.f32 %v1826_v59, %v2778_v38  ;;  %v617_v16 = vmul.f32 %v1812_v39, %v2774_v11  ;;  %v2788_v18 = vld [vmem:[#allocation31_spill] sm:$0xff] }
  0x8a   :  { %v609_v45 = vadd.f32 %v602_v61, %v532_v63  ;;  %v672_v49 = vmax.f32 %v665_v28, 0.0  ;;  %v449_v1 = vadd.f32 %v442_v56, %v427_v42  ;;  %v498_v29 = vadd.f32 %v491_v26, %v484_v62  ;;  %v377_v63 = vld [vmem:[#allocation5 + $0x30] sm:$0x1]  ;;  %v392_v61 = vld [vmem:[#allocation5 + $0x68] sm:$0x1] }
  0x8b   :  { %v554_v48 = vadd.f32 %v547_v55, %v540_v41  ;;  %v624_v32 = vmul.f32 %v1820_v5, %v2776_v57  ;;  %v638_v3 = vmul.f32 %v1823_v10, %v2778_v38  ;;  %v659_v40 = vmul.f32 %v1826_v59, %v2779_v53  ;;  %v414_v28 = vld [vmem:[#allocation5 + $0xd8] sm:$0x1]  ;;  %v472_v38 = vld [vmem:[#allocation5 + $0xa0] sm:$0x1]  ;;  %v507_v53 = vld [vmem:[#allocation5 + $0x148] sm:$0x1] }
  0x8c   :  { %v679_v25 = vadd.f32 %v672_v49, %v609_v45  ;;  %v456_v31 = vmax.f32 %v449_v1, 0.0  ;;  %v519_v50 = vadd.f32 %v512_v33, %v498_v29  ;;  %v384_v51 = vmul.f32 %v1812_v39, %v2780_v43  ;;  %v436_v1 = vld [vmem:[#allocation5 + $0x110] sm:$0x1]  ;;  %v563_v43 = vld [vmem:[#allocation5 + $0x180] sm:$0x1] }
  0x8d   :  { %v575_v8 = vadd.f32 %v568_v19, %v554_v48  ;;  %v631_v44 = vadd.f32 %v624_v32, %v617_v16  ;;  %v399_v15 = vmul.f32 %v1820_v5, %v2781_v58  ;;  %v421_v36 = vmul.f32 %v1823_v10, %v2782_v20 }
  0x8e   :  { %1355 = vst [vmem:[%s2666_s2 + $0x50] sm:$0xff] %v679_v25  ;;  %v526_v2 = vmax.f32 %v519_v50, 0.0  ;;  %v443_v60 = vmul.f32 %v1826_v59, %v2783_v37  ;;  %v464_v46 = vmul.f32 %v1812_v39, %v2781_v58  ;;  %v478_v12 = vmul.f32 %v1820_v5, %v2784_v21 }
  0x8f   :  { %v596_v47 = vadd.f32 %v589_v17, %v575_v8  ;;  %v645_v6 = vadd.f32 %v638_v3, %v631_v44  ;;  %v406_v52 = vadd.f32 %v399_v15, %v384_v51  ;;  %v492_v7 = vmul.f32 %v1823_v10, %v2783_v37  ;;  %v584_v15 = vld [vmem:[#allocation5 + $0x1b8] sm:$0x1] }
  0x90   :  { %v533_v13 = vadd.f32 %v526_v2, %v456_v31  ;;  %v485_v4 = vadd.f32 %v478_v12, %v464_v46  ;;  %v513_v35 = vmul.f32 %v1826_v59, %v2785_v27  ;;  %v541_v24 = vmul.f32 %v1812_v39, %v2782_v20 }
  0x91   :  { %v603_v22 = vmax.f32 %v596_v47, 0.0  ;;  %v666_v23 = vadd.f32 %v659_v40, %v645_v6  ;;  %v428_v11 = vadd.f32 %v421_v36, %v406_v52  ;;  %v548_v56 = vmul.f32 %v1820_v5, %v2783_v37  ;;  %v654_v47 = vld [vmem:[#allocation5 + $0x1f0] sm:$0x1] }
  0x92   :  { %v499_v14 = vadd.f32 %v492_v7, %v485_v4  ;;  %v569_v30 = vmul.f32 %v1823_v10, %v2786_v9  ;;  %v590_v34 = vmul.f32 %v1826_v59, %v2787_v0  ;;  %v618_v54 = vmul.f32 %v1812_v39, %v2783_v37  ;;  %v2065_v9 = vld [vmem:[#allocation5 + $0x38] sm:$0xff] }
  0x93   :  { %v610_v26 = vadd.f32 %v603_v22, %v533_v13  ;;  %v673_v57 = vmax.f32 %v666_v23, 0.0  ;;  %v450_v33 = vadd.f32 %v443_v60, %v428_v11  ;;  %v555_v41 = vadd.f32 %v548_v56, %v541_v24  ;;  %v2058_v22 = vld [vmem:[#allocation5] sm:$0xff] }
  0x94   :  { %v520_v42 = vadd.f32 %v513_v35, %v499_v14  ;;  %v625_v62 = vmul.f32 %v1820_v5, %v2785_v27  ;;  %v639_v55 = vmul.f32 %v1823_v10, %v2787_v0  ;;  %v660_v19 = vmul.f32 %v1826_v59, %v2788_v18 }
  0x95   :  { %v680_v17 = vadd.f32 %v673_v57, %v610_v26  ;;  %v457_v16 = vmax.f32 %v450_v33, 0.0  ;;  %v576_v45 = vadd.f32 %v569_v30, %v555_v41  ;;  %v385_v49 = vmul.f32 %v1812_v39, %v377_v63  ;;  %v2067_v30 = vld [vmem:[#allocation5 + $0xa8] sm:$0xff] }
  0x96   :  { %v527_v29 = vmax.f32 %v520_v42, 0.0  ;;  %v632_v48 = vadd.f32 %v625_v62, %v618_v54  ;;  %v400_v32 = vmul.f32 %v1820_v5, %v392_v61  ;;  %v422_v3 = vmul.f32 %v1823_v10, %v414_v28  ;;  %v2088_v42 = vld [vmem:[#allocation5 + $0x118] sm:$0xff] }
  0x97   :  { %1356 = vst [vmem:[%s2666_s2 + $0x58] sm:$0xff] %v680_v17  ;;  %v597_v40 = vadd.f32 %v590_v34, %v576_v45  ;;  %v444_v25 = vmul.f32 %v1826_v59, %v436_v1  ;;  %v465_v31 = vmul.f32 %v392_v61, %v1812_v39  ;;  %v479_v50 = vmul.f32 %v472_v38, %v1820_v5 }
  0x98   :  { %v534_v51 = vadd.f32 %v527_v29, %v457_v16  ;;  %v646_v8 = vadd.f32 %v639_v55, %v632_v48  ;;  %v407_v44 = vadd.f32 %v400_v32, %v385_v49  ;;  %v493_v58 = vmul.f32 %v436_v1, %v1823_v10  ;;  %v2099_v49 = vld [vmem:[#allocation5 + $0x150] sm:$0xff] }
  0x99   :  { %v604_v20 = vmax.f32 %v597_v40, 0.0  ;;  %v486_v36 = vadd.f32 %v479_v50, %v465_v31  ;;  %v514_v2 = vmul.f32 %v507_v53, %v1826_v59  ;;  %v542_v37 = vmul.f32 %v414_v28, %v1812_v39  ;;  %v2086_v28 = vld [vmem:[#allocation5 + $0xe0] sm:$0xff] }
  0x9a   :  { %v667_v60 = vadd.f32 %v660_v19, %v646_v8  ;;  %v429_v46 = vadd.f32 %v422_v3, %v407_v44  ;;  %v549_v21 = vmul.f32 %v436_v1, %v1820_v5  ;;  %v570_v12 = vmul.f32 %v563_v43, %v1823_v10  ;;  %v2111_v50 = vld [vmem:[#allocation5 + $0x1c0] sm:$0xff]  ;;  %v2113_v43 = vld [vmem:[#allocation5 + $0x8] sm:$0xff] }
  0x9b   :  { %v611_v6 = vadd.f32 %v604_v20, %v534_v51  ;;  %v500_v52 = vadd.f32 %v493_v58, %v486_v36  ;;  %v591_v7 = vmul.f32 %v584_v15, %v1826_v59  ;;  %v619_v13 = vmul.f32 %v436_v1, %v1812_v39  ;;  %v2101_v1 = vld [vmem:[#allocation5 + $0x188] sm:$0xff] }
  0x9c   :  { %v674_v4 = vmax.f32 %v667_v60, 0.0  ;;  %v451_v27 = vadd.f32 %v444_v25, %v429_v46  ;;  %v556_v35 = vadd.f32 %v549_v21, %v542_v37  ;;  %v626_v24 = vmul.f32 %v507_v53, %v1820_v5  ;;  %v2069_v5 = vld [vmem:[#allocation5 + $0x70] sm:$0xff] }
  0x9d   :  { %v521_v23 = vadd.f32 %v514_v2, %v500_v52  ;;  %v640_v11 = vmul.f32 %v584_v15, %v1823_v10  ;;  %v661_v56 = vmul.f32 %v654_v47, %v1826_v59  ;;  %v2063_v14 = vstv %s2034_s4  ;;  %v2121_v15 = vld [vmem:[#allocation5 + $0x40] sm:$0xff]  ;;  %v2125_v60 = vld [vmem:[#allocation5 + $0xb0] sm:$0xff] }
  0x9e   :  { %v681_v39 = vadd.f32 %v674_v4, %v611_v6  ;;  %v458_v0 = vmax.f32 %v451_v27, 0.0  ;;  %v577_v34 = vadd.f32 %v570_v12, %v556_v35  ;;  %v633_v54 = vadd.f32 %v626_v24, %v619_v13  ;;  %v2133_v6 = vld [vmem:[#allocation5 + $0x78] sm:$0xff]  ;;  %v2140_v27 = vld [vmem:[#allocation5 + $0xe8] sm:$0xff]  ;;  %v2142_v35 = vld [vmem:[#allocation5 + $0x120] sm:$0xff] }
  0x9f   :  { %v528_v63 = vmax.f32 %v521_v23, 0.0  ;;  %v703_v26 = vmul.f32 %v2063_v14, %v2058_v22  ;;  %v2074_v10 = vstv %s2044_s7  ;;  %v2077_v59 = vstv %s2046_s1 }
  0xa0   :  { %1357 = vst [vmem:[%s2666_s2 + $0x60] sm:$0xff] %v681_v39  ;;  %v598_v57 = vadd.f32 %v591_v7, %v577_v34  ;;  %v647_v33 = vadd.f32 %v640_v11, %v633_v54  ;;  %v718_v41 = vmul.f32 %v2074_v10, %v2065_v9  ;;  %v740_v61 = vmul.f32 %v2077_v59, %v2067_v30 }
  0xa1   :  { %v535_v62 = vadd.f32 %v528_v63, %v458_v0  ;;  %v2091_v55 = vstv %s2051_s8  ;;  %v783_v18 = vmul.f32 %v2065_v9, %v2063_v14  ;;  %v797_v19 = vmul.f32 %v2069_v5, %v2074_v10  ;;  %v2152_v63 = vld [vmem:[#allocation5 + $0x158] sm:$0xff] }
  0xa2   :  { %v605_v38 = vmax.f32 %v598_v57, 0.0  ;;  %v668_v17 = vadd.f32 %v661_v56, %v647_v33  ;;  %v725_v16 = vadd.f32 %v718_v41, %v703_v26  ;;  %v762_v45 = vmul.f32 %v2091_v55, %v2086_v28  ;;  %v2154_v26 = vld [vmem:[#allocation5 + $0x190] sm:$0xff] }
  0xa3   :  { %v804_v29 = vadd.f32 %v797_v19, %v783_v18  ;;  %v811_v48 = vmul.f32 %v2086_v28, %v2077_v59  ;;  %v832_v32 = vmul.f32 %v2088_v42, %v2091_v55  ;;  %v860_v3 = vmul.f32 %v2067_v30, %v2063_v14 }
  0xa4   :  { %v612_v53 = vadd.f32 %v605_v38, %v535_v62  ;;  %v675_v40 = vmax.f32 %v668_v17, 0.0  ;;  %v747_v25 = vadd.f32 %v740_v61, %v725_v16  ;;  %v867_v31 = vmul.f32 %v2086_v28, %v2074_v10  ;;  %v2162_v17 = vld [vmem:[#allocation5 + $0x1c8] sm:$0xff] }
  0xa5   :  { %v818_v51 = vadd.f32 %v811_v48, %v804_v29  ;;  %v888_v8 = vmul.f32 %v2099_v49, %v2077_v59  ;;  %v909_v44 = vmul.f32 %v2101_v1, %v2091_v55  ;;  %v937_v58 = vmul.f32 %v2086_v28, %v2063_v14 }
  0xa6   :  { %v682_v20 = vadd.f32 %v675_v40, %v612_v53  ;;  %v769_v36 = vadd.f32 %v762_v45, %v747_v25  ;;  %v874_v2 = vadd.f32 %v867_v31, %v860_v3  ;;  %v944_v37 = vmul.f32 %v2088_v42, %v2074_v10  ;;  %v2174_v31 = vld [vmem:[#allocation5 + $0x48] sm:$0xff] }
  0xa7   :  { %v839_v46 = vadd.f32 %v832_v32, %v818_v51  ;;  %v958_v21 = vmul.f32 %v2101_v1, %v2077_v59  ;;  %v979_v12 = vmul.f32 %v2111_v50, %v2091_v55  ;;  %v704_v47 = vmul.f32 %v2063_v14, %v2113_v43  ;;  %v2172_v32 = vld [vmem:[#allocation5 + $0x10] sm:$0xff]  ;;  %v2176_v51 = vld [vmem:[#allocation5 + $0xb8] sm:$0xff] }
  0xa8   :  { %1358 = vst [vmem:[%s2666_s2 + $0x68] sm:$0x1] %v682_v20  ;;  %v776_v52 = vmax.f32 %v769_v36, 0.0  ;;  %v895_v7 = vadd.f32 %v888_v8, %v874_v2  ;;  %v951_v13 = vadd.f32 %v944_v37, %v937_v58  ;;  %v719_v4 = vmul.f32 %v2074_v10, %v2121_v15  ;;  %v2184_v36 = vld [vmem:[#allocation5 + $0x80] sm:$0xff] }
  0xa9   :  { %v846_v24 = vmax.f32 %v839_v46, 0.0  ;;  %v741_v23 = vmul.f32 %v2077_v59, %v2125_v60  ;;  %v763_v11 = vmul.f32 %v2091_v55, %v2140_v27  ;;  %v784_v56 = vmul.f32 %v2121_v15, %v2063_v14 }
  0xaa   :  { %v916_v39 = vadd.f32 %v909_v44, %v895_v7  ;;  %v965_v0 = vadd.f32 %v958_v21, %v951_v13  ;;  %v726_v34 = vadd.f32 %v719_v4, %v704_v47  ;;  %v798_v54 = vmul.f32 %v2133_v6, %v2074_v10  ;;  %v2194_v4 = vld [vmem:[#allocation5 + $0x128] sm:$0xff] }
  0xab   :  { %v853_v57 = vadd.f32 %v846_v24, %v776_v52  ;;  %v812_v33 = vmul.f32 %v2140_v27, %v2077_v59  ;;  %v833_v41 = vmul.f32 %v2142_v35, %v2091_v55  ;;  %v861_v61 = vmul.f32 %v2125_v60, %v2063_v14 }
  0xac   :  { %v923_v62 = vmax.f32 %v916_v39, 0.0  ;;  %v986_v18 = vadd.f32 %v979_v12, %v965_v0  ;;  %v748_v19 = vadd.f32 %v741_v23, %v726_v34  ;;  %v805_v38 = vadd.f32 %v798_v54, %v784_v56  ;;  %v2188_v12 = vld [vmem:[#allocation5 + $0xf0] sm:$0xff] }
  0xad   :  { %v868_v16 = vmul.f32 %v2140_v27, %v2074_v10  ;;  %v889_v45 = vmul.f32 %v2152_v63, %v2077_v59  ;;  %v910_v29 = vmul.f32 %v2154_v26, %v2091_v55  ;;  %v938_v48 = vmul.f32 %v2140_v27, %v2063_v14 }
  0xae   :  { %v930_v3 = vadd.f32 %v923_v62, %v853_v57  ;;  %v993_v53 = vmax.f32 %v986_v18, 0.0  ;;  %v770_v40 = vadd.f32 %v763_v11, %v748_v19  ;;  %v819_v25 = vadd.f32 %v812_v33, %v805_v38  ;;  %v2207_v57 = vld [vmem:[#allocation5 + $0x160] sm:$0xff]  ;;  %v2209_v33 = vld [vmem:[#allocation5 + $0x198] sm:$0xff] }
  0xaf   :  { %v875_v8 = vadd.f32 %v868_v16, %v861_v61  ;;  %v945_v44 = vmul.f32 %v2142_v35, %v2074_v10  ;;  %v959_v58 = vmul.f32 %v2154_v26, %v2077_v59  ;;  %v980_v20 = vmul.f32 %v2162_v17, %v2091_v55 }
  0xb0   :  { %v1000_v2 = vadd.f32 %v993_v53, %v930_v3  ;;  %v777_v37 = vmax.f32 %v770_v40, 0.0  ;;  %v840_v46 = vadd.f32 %v833_v41, %v819_v25  ;;  %v705_v21 = vmul.f32 %v2063_v14, %v2172_v32  ;;  %v2225_v25 = vld [vmem:[#allocation5 + $0x18] sm:$0xff] }
  0xb1   :  { %v896_v47 = vadd.f32 %v889_v45, %v875_v8  ;;  %v952_v52 = vadd.f32 %v945_v44, %v938_v48  ;;  %v720_v7 = vmul.f32 %v2074_v10, %v2174_v31  ;;  %v742_v13 = vmul.f32 %v2077_v59, %v2176_v51 }
  0xb2   :  { %1363 = vst [vmem:[%s2666_s2 + $0x70] sm:$0xff] %v1000_v2  ;;  %v847_v24 = vmax.f32 %v840_v46, 0.0  ;;  %v764_v23 = vmul.f32 %v2091_v55, %v2188_v12  ;;  %v785_v11 = vmul.f32 %v2174_v31, %v2063_v14  ;;  %v799_v56 = vmul.f32 %v2184_v36, %v2074_v10  ;;  %v2227_v2 = vld [vmem:[#allocation5 + $0x50] sm:$0xff] }
  0xb3   :  { %v917_v39 = vadd.f32 %v910_v29, %v896_v47  ;;  %v966_v0 = vadd.f32 %v959_v58, %v952_v52  ;;  %v727_v34 = vadd.f32 %v720_v7, %v705_v21  ;;  %v813_v54 = vmul.f32 %v2188_v12, %v2077_v59  ;;  %v2217_v29 = vld [vmem:[#allocation5 + $0x1d0] sm:$0xff]  ;;  %v2237_v7 = vld [vmem:[#allocation5 + $0x88] sm:$0xff] }
  0xb4   :  { %v854_v41 = vadd.f32 %v847_v24, %v777_v37  ;;  %v806_v61 = vadd.f32 %v799_v56, %v785_v11  ;;  %v834_v62 = vmul.f32 %v2194_v4, %v2091_v55  ;;  %v862_v18 = vmul.f32 %v2176_v51, %v2063_v14  ;;  %v2229_v37 = vld [vmem:[#allocation5 + $0xc0] sm:$0xff]  ;;  %2790 = vst [vmem:[#allocation8_spill] sm:$0xff] %v2237_v7  ;;  %v2241_v56 = vld [vmem:[#allocation5 + $0xf8] sm:$0xff] }
  0xb5   :  { %v924_v19 = vmax.f32 %v917_v39, 0.0  ;;  %v987_v38 = vadd.f32 %v980_v20, %v966_v0  ;;  %v749_v16 = vadd.f32 %v742_v13, %v727_v34  ;;  %v869_v45 = vmul.f32 %v2188_v12, %v2074_v10  ;;  %2789 = vst [vmem:[#allocation9_spill] sm:$0xff] %v2229_v37  ;;  %2791 = vst [vmem:[#allocation10_spill] sm:$0xff] %v2241_v56 }
  0xb6   :  { %v820_v48 = vadd.f32 %v813_v54, %v806_v61  ;;  %v890_v3 = vmul.f32 %v2207_v57, %v2077_v59  ;;  %v911_v53 = vmul.f32 %v2209_v33, %v2091_v55  ;;  %v939_v40 = vmul.f32 %v2188_v12, %v2063_v14 }
  0xb7   :  { %v931_v8 = vadd.f32 %v924_v19, %v854_v41  ;;  %v994_v44 = vmax.f32 %v987_v38, 0.0  ;;  %v771_v58 = vadd.f32 %v764_v23, %v749_v16  ;;  %v876_v20 = vadd.f32 %v869_v45, %v862_v18  ;;  %v2247_v41 = vld [vmem:[#allocation5 + $0x130] sm:$0xff]  ;;  %v2258_v38 = vld [vmem:[#allocation5 + $0x168] sm:$0xff] }
  0xb8   :  { %v841_v46 = vadd.f32 %v834_v62, %v820_v48  ;;  %v946_v21 = vmul.f32 %v2194_v4, %v2074_v10  ;;  %v960_v47 = vmul.f32 %v2209_v33, %v2077_v59  ;;  %v981_v52 = vmul.f32 %v2217_v29, %v2091_v55  ;;  %2792 = vst [vmem:[#allocation11_spill] sm:$0xff] %v2247_v41 }
  0xb9   :  { %v1001_v13 = vadd.f32 %v994_v44, %v931_v8  ;;  %v778_v24 = vmax.f32 %v771_v58, 0.0  ;;  %v897_v23 = vadd.f32 %v890_v3, %v876_v20  ;;  %v706_v11 = vmul.f32 %v2063_v14, %v2225_v25  ;;  %2793 = vst [vmem:[#allocation12_spill] sm:$0xff] %v2258_v38 }
  0xba   :  { %v848_v39 = vmax.f32 %v841_v46, 0.0  ;;  %v953_v0 = vadd.f32 %v946_v21, %v939_v40  ;;  %v721_v34 = vmul.f32 %v2074_v10, %v2227_v2  ;;  %v743_v54 = vmul.f32 %v2077_v59, %v2229_v37  ;;  %v2262_v40 = vld [vmem:[#allocation5 + $0x1a0] sm:$0xff] }
  0xbb   :  { %1364 = vst [vmem:[%s2666_s2 + $0x78] sm:$0xff] %v1001_v13  ;;  %v918_v61 = vadd.f32 %v911_v53, %v897_v23  ;;  %v765_v62 = vmul.f32 %v2091_v55, %v2241_v56  ;;  %v786_v18 = vmul.f32 %v2227_v2, %v2063_v14  ;;  %v800_v19 = vmul.f32 %v2237_v7, %v2074_v10  ;;  %v2272_v13 = vld [vmem:[#allocation5 + $0x1d8] sm:$0xff] }
  0xbc   :  { %v855_v16 = vadd.f32 %v848_v39, %v778_v24  ;;  %v967_v45 = vadd.f32 %v960_v47, %v953_v0  ;;  %v728_v48 = vadd.f32 %v721_v34, %v706_v11  ;;  %v814_v3 = vmul.f32 %v2241_v56, %v2077_v59  ;;  %2794 = vst [vmem:[#allocation13_spill] sm:$0xff] %v2262_v40  ;;  %v2274_v24 = vld [vmem:[#allocation5 + $0x20] sm:$0xff] }
  0xbd   :  { %v925_v53 = vmax.f32 %v918_v61, 0.0  ;;  %v807_v8 = vadd.f32 %v800_v19, %v786_v18  ;;  %v835_v44 = vmul.f32 %v2247_v41, %v2091_v55  ;;  %v863_v58 = vmul.f32 %v2229_v37, %v2063_v14  ;;  %2795 = vst [vmem:[#allocation14_spill] sm:$0xff] %v2272_v13  ;;  %2796 = vst [vmem:[#allocation15_spill] sm:$0xff] %v2274_v24  ;;  %v2282_v18 = vld [vmem:[#allocation5 + $0x58] sm:$0xff]  ;;  %v2284_v19 = vld [vmem:[#allocation5 + $0xc8] sm:$0xff] }
  0xbe   :  { %v988_v20 = vadd.f32 %v981_v52, %v967_v45  ;;  %v750_v46 = vadd.f32 %v743_v54, %v728_v48  ;;  %v870_v21 = vmul.f32 %v2241_v56, %v2074_v10  ;;  %v891_v47 = vmul.f32 %v2258_v38, %v2077_v59  ;;  %2797 = vst [vmem:[#allocation16_spill] sm:$0xff] %v2282_v18  ;;  %v2339_v38 = vld [vmem:[#allocation5 + $0xd0] sm:$0xff] }
  0xbf   :  { %v932_v23 = vadd.f32 %v925_v53, %v855_v16  ;;  %v821_v11 = vadd.f32 %v814_v3, %v807_v8  ;;  %v912_v39 = vmul.f32 %v2262_v40, %v2091_v55  ;;  %v940_v0 = vmul.f32 %v2241_v56, %v2063_v14  ;;  %2798 = vst [vmem:[#allocation18_spill] sm:$0xff] %v2284_v19  ;;  %v2292_v53 = vld [vmem:[#allocation5 + $0x90] sm:$0xff] }
  0xc0   :  { %v995_v52 = vmax.f32 %v988_v20, 0.0  ;;  %v772_v34 = vadd.f32 %v765_v62, %v750_v46  ;;  %v877_v54 = vadd.f32 %v870_v21, %v863_v58  ;;  %v947_v61 = vmul.f32 %v2247_v41, %v2074_v10  ;;  %2799 = vst [vmem:[#allocation17_spill] sm:$0xff] %v2292_v53  ;;  %v2294_v46 = vld [vmem:[#allocation5 + $0x100] sm:$0xff]  ;;  %v2296_v21 = vld [vmem:[#allocation5 + $0x138] sm:$0xff]  ;;  %2807 = vst [vmem:[#allocation27_spill] sm:$0xff] %v2339_v38 }
  0xc1   :  { %v842_v45 = vadd.f32 %v835_v44, %v821_v11  ;;  %v961_v16 = vmul.f32 %v2262_v40, %v2077_v59  ;;  %v982_v48 = vmul.f32 %v2272_v13, %v2091_v55  ;;  %v707_v3 = vmul.f32 %v2063_v14, %v2274_v24  ;;  %2800 = vst [vmem:[#allocation19_spill] sm:$0xff] %v2294_v46 }
  0xc2   :  { %v1002_v62 = vadd.f32 %v995_v52, %v932_v23  ;;  %v779_v8 = vmax.f32 %v772_v34, 0.0  ;;  %v898_v58 = vadd.f32 %v891_v47, %v877_v54  ;;  %v954_v20 = vadd.f32 %v947_v61, %v940_v0  ;;  %2801 = vst [vmem:[#allocation20_spill] sm:$0xff] %v2296_v21  ;;  %v2311_v34 = vld [vmem:[#allocation5 + $0x170] sm:$0xff]  ;;  %v2313_v54 = vld [vmem:[#allocation5 + $0x1a8] sm:$0xff] }
  0xc3   :  { %v849_v44 = vmax.f32 %v842_v45, 0.0  ;;  %v722_v11 = vmul.f32 %v2074_v10, %v2282_v18  ;;  %v744_v13 = vmul.f32 %v2077_v59, %v2284_v19  ;;  %v766_v24 = vmul.f32 %v2091_v55, %v2294_v46  ;;  %2802 = vst [vmem:[#allocation21_spill] sm:$0xff] %v2311_v34  ;;  %2803 = vst [vmem:[#allocation22_spill] sm:$0xff] %v2313_v54 }
  0xc4   :  { %1365 = vst [vmem:[%s2666_s2 + $0x80] sm:$0xff] %v1002_v62  ;;  %v919_v47 = vadd.f32 %v912_v39, %v898_v58  ;;  %v968_v23 = vadd.f32 %v961_v16, %v954_v20  ;;  %v787_v0 = vmul.f32 %v2282_v18, %v2063_v14  ;;  %v801_v52 = vmul.f32 %v2292_v53, %v2074_v10 }
  0xc5   :  { %v856_v61 = vadd.f32 %v849_v44, %v779_v8  ;;  %v729_v45 = vadd.f32 %v722_v11, %v707_v3  ;;  %v815_v40 = vmul.f32 %v2294_v46, %v2077_v59  ;;  %v836_v62 = vmul.f32 %v2296_v21, %v2091_v55  ;;  %v2327_v44 = vld [vmem:[#allocation5 + $0x1e0] sm:$0xff]  ;;  %v2329_v11 = vld [vmem:[#allocation5 + $0x28] sm:$0xff] }
  0xc6   :  { %v926_v39 = vmax.f32 %v919_v47, 0.0  ;;  %v989_v16 = vadd.f32 %v982_v48, %v968_v23  ;;  %v808_v58 = vadd.f32 %v801_v52, %v787_v0  ;;  %v864_v20 = vmul.f32 %v2284_v19, %v2063_v14  ;;  %2804 = vst [vmem:[#allocation23_spill] sm:$0xff] %v2327_v44  ;;  %2805 = vst [vmem:[#allocation24_spill] sm:$0xff] %v2329_v11 }
  0xc7   :  { %v751_v18 = vadd.f32 %v744_v13, %v729_v45  ;;  %v871_v53 = vmul.f32 %v2294_v46, %v2074_v10  ;;  %v892_v8 = vmul.f32 %v2311_v34, %v2077_v59  ;;  %v913_v3 = vmul.f32 %v2313_v54, %v2091_v55  ;;  %v2333_v13 = vld [vmem:[#allocation5 + $0x60] sm:$0xff] }
  0xc8   :  { %v933_v47 = vadd.f32 %v926_v39, %v856_v61  ;;  %v996_v48 = vmax.f32 %v989_v16, 0.0  ;;  %v822_v23 = vadd.f32 %v815_v40, %v808_v58  ;;  %v941_v0 = vmul.f32 %v2294_v46, %v2063_v14  ;;  %2806 = vst [vmem:[#allocation25_spill] sm:$0xff] %v2333_v13  ;;  %v2345_v39 = vld [vmem:[#allocation5 + $0x98] sm:$0xff]  ;;  %v2349_v58 = vld [vmem:[#allocation5 + $0x108] sm:$0xff]  ;;  %v796_v46 = vld [vmem:[#allocation5 + $0xa0] sm:$0x1] }
  0xc9   :  { %v773_v52 = vadd.f32 %v766_v24, %v751_v18  ;;  %v878_v45 = vadd.f32 %v871_v53, %v864_v20  ;;  %v948_v34 = vmul.f32 %v2296_v21, %v2074_v10  ;;  %v962_v19 = vmul.f32 %v2313_v54, %v2077_v59  ;;  %2808 = vst [vmem:[#allocation26_spill] sm:$0xff] %v2345_v39  ;;  %v2351_v20 = vld [vmem:[#allocation5 + $0x140] sm:$0xff]  ;;  %v701_v54 = vld [vmem:[#allocation5 + $0x30] sm:$0x1] }
  0xca   :  { %v1003_v41 = vadd.f32 %v996_v48, %v933_v47  ;;  %v843_v7 = vadd.f32 %v836_v62, %v822_v23  ;;  %v983_v40 = vmul.f32 %v2327_v44, %v2091_v55  ;;  %v708_v61 = vmul.f32 %v2063_v14, %v2329_v11  ;;  %2809 = vst [vmem:[#allocation28_spill] sm:$0xff] %v2349_v58  ;;  %v2366_v11 = vld [vmem:[#allocation5 + $0x1b0] sm:$0xff] }
  0xcb   :  { %v780_v24 = vmax.f32 %v773_v52, 0.0  ;;  %v899_v18 = vadd.f32 %v892_v8, %v878_v45  ;;  %v955_v53 = vadd.f32 %v948_v34, %v941_v0  ;;  %v723_v16 = vmul.f32 %v2074_v10, %v2333_v13  ;;  %v2364_v45 = vld [vmem:[#allocation5 + $0x178] sm:$0xff]  ;;  %2811 = vst [vmem:[#allocation30_spill] sm:$0xff] %v2366_v11 }
  0xcc   :  { %1366 = vst [vmem:[%s2666_s2 + $0x88] sm:$0xff] %v1003_v41  ;;  %v850_v62 = vmax.f32 %v843_v7, 0.0  ;;  %v745_v47 = vmul.f32 %v2077_v59, %v2339_v38  ;;  %v767_v48 = vmul.f32 %v2091_v55, %v2349_v58  ;;  %v788_v34 = vmul.f32 %v2333_v13, %v2063_v14  ;;  %2810 = vst [vmem:[#allocation29_spill] sm:$0xff] %v2364_v45 }
  0xcd   :  { %v920_v8 = vadd.f32 %v913_v3, %v899_v18  ;;  %v969_v23 = vadd.f32 %v962_v19, %v955_v53  ;;  %v730_v0 = vadd.f32 %v723_v16, %v708_v61  ;;  %v802_v52 = vmul.f32 %v2345_v39, %v2074_v10  ;;  %v2374_v53 = vld [vmem:[#allocation5 + $0x1e8] sm:$0xff] }
  0xce   :  { %v857_v7 = vadd.f32 %v850_v62, %v780_v24  ;;  %v816_v41 = vmul.f32 %v2349_v58, %v2077_v59  ;;  %v837_v44 = vmul.f32 %v2351_v20, %v2091_v55  ;;  %v865_v13 = vmul.f32 %v2339_v38, %v2063_v14  ;;  %2812 = vst [vmem:[#allocation31_spill] sm:$0xff] %v2374_v53 }
  0xcf   :  { %v927_v3 = vmax.f32 %v920_v8, 0.0  ;;  %v990_v19 = vadd.f32 %v983_v40, %v969_v23  ;;  %v752_v61 = vadd.f32 %v745_v47, %v730_v0  ;;  %v809_v18 = vadd.f32 %v802_v52, %v788_v34  ;;  %v716_v34 = vld [vmem:[#allocation5 + $0x68] sm:$0x1]  ;;  %v738_v23 = vld [vmem:[#allocation5 + $0xd8] sm:$0x1] }
  0xd0   :  { %v872_v16 = vmul.f32 %v2349_v58, %v2074_v10  ;;  %v893_v24 = vmul.f32 %v2364_v45, %v2077_v59  ;;  %v914_v62 = vmul.f32 %v2366_v11, %v2091_v55  ;;  %v942_v39 = vmul.f32 %v2349_v58, %v2063_v14 }
  0xd1   :  { %v934_v38 = vadd.f32 %v927_v3, %v857_v7  ;;  %v997_v8 = vmax.f32 %v990_v19, 0.0  ;;  %v774_v40 = vadd.f32 %v767_v48, %v752_v61  ;;  %v823_v47 = vadd.f32 %v816_v41, %v809_v18  ;;  %v760_v48 = vld [vmem:[#allocation5 + $0x110] sm:$0x1]  ;;  %v831_v61 = vld [vmem:[#allocation5 + $0x148] sm:$0x1] }
  0xd2   :  { %v879_v0 = vadd.f32 %v872_v16, %v865_v13  ;;  %v949_v52 = vmul.f32 %v2351_v20, %v2074_v10  ;;  %v963_v45 = vmul.f32 %v2366_v11, %v2077_v59  ;;  %v984_v21 = vmul.f32 %v2374_v53, %v2091_v55 }
  0xd3   :  { %v1004_v56 = vadd.f32 %v997_v8, %v934_v38  ;;  %v781_v58 = vmax.f32 %v774_v40, 0.0  ;;  %v844_v37 = vadd.f32 %v837_v44, %v823_v47  ;;  %v709_v7 = vmul.f32 %v2063_v14, %v701_v54  ;;  %v887_v40 = vld [vmem:[#allocation5 + $0x180] sm:$0x1]  ;;  %v908_v47 = vld [vmem:[#allocation5 + $0x1b8] sm:$0x1] }
  0xd4   :  { %v900_v41 = vadd.f32 %v893_v24, %v879_v0  ;;  %v956_v3 = vadd.f32 %v949_v52, %v942_v39  ;;  %v724_v13 = vmul.f32 %v2074_v10, %v716_v34  ;;  %v746_v19 = vmul.f32 %v2077_v59, %v738_v23 }
  0xd5   :  { %1367 = vst [vmem:[%s2666_s2 + $0x90] sm:$0xff] %v1004_v56  ;;  %v851_v18 = vmax.f32 %v844_v37, 0.0  ;;  %v768_v38 = vmul.f32 %v2091_v55, %v760_v48  ;;  %v789_v44 = vmul.f32 %v716_v34, %v2063_v14  ;;  %v803_v54 = vmul.f32 %v796_v46, %v2074_v10 }
  0xd6   :  { %v921_v39 = vadd.f32 %v914_v62, %v900_v41  ;;  %v970_v16 = vadd.f32 %v963_v45, %v956_v3  ;;  %v731_v24 = vadd.f32 %v724_v13, %v709_v7  ;;  %v817_v8 = vmul.f32 %v760_v48, %v2077_v59  ;;  %v978_v62 = vld [vmem:[#allocation5 + $0x1f0] sm:$0x1] }
  0xd7   :  { %v858_v37 = vadd.f32 %v851_v18, %v781_v58  ;;  %v810_v56 = vadd.f32 %v803_v54, %v789_v44  ;;  %v838_v0 = vmul.f32 %v831_v61, %v2091_v55  ;;  %v866_v34 = vmul.f32 %v738_v23, %v2063_v14 }
  0xd8   :  { %v928_v46 = vmax.f32 %v921_v39, 0.0  ;;  %v991_v52 = vadd.f32 %v984_v21, %v970_v16  ;;  %v753_v53 = vadd.f32 %v746_v19, %v731_v24  ;;  %v873_v11 = vmul.f32 %v760_v48, %v2074_v10 }
  0xd9   :  { %v824_v45 = vadd.f32 %v817_v8, %v810_v56  ;;  %v894_v7 = vmul.f32 %v887_v40, %v2077_v59  ;;  %v915_v41 = vmul.f32 %v908_v47, %v2091_v55  ;;  %v943_v3 = vmul.f32 %v760_v48, %v2063_v14 }
  0xda   :  { %v935_v58 = vadd.f32 %v928_v46, %v858_v37  ;;  %v998_v13 = vmax.f32 %v991_v52, 0.0  ;;  %v775_v18 = vadd.f32 %v768_v38, %v753_v53  ;;  %v880_v44 = vadd.f32 %v873_v11, %v866_v34 }
  0xdb   :  { %v845_v23 = vadd.f32 %v838_v0, %v824_v45  ;;  %v950_v21 = vmul.f32 %v831_v61, %v2074_v10  ;;  %v964_v19 = vmul.f32 %v908_v47, %v2077_v59  ;;  %v985_v54 = vmul.f32 %v978_v62, %v2091_v55 }
  0xdc   :  { %v1005_v39 = vadd.f32 %v998_v13, %v935_v58  ;;  %v782_v16 = vmax.f32 %v775_v18, 0.0  ;;  %v901_v24 = vadd.f32 %v894_v7, %v880_v44  ;;  %v2418_v8 = vstv %s2393_s21 }
  0xdd   :  { %v852_v14 = vmax.f32 %v845_v23, 0.0  ;;  %v957_v48 = vadd.f32 %v950_v21, %v943_v3  ;;  %v1027_v53 = vmul.f32 %v2418_v8, %v2058_v22  ;;  %v2423_v11 = vstv %s2401_s24 }
  0xde   :  { %1368 = vst [vmem:[%s2666_s2 + $0x98] sm:$0xff] %v1005_v39  ;;  %v922_v10 = vadd.f32 %v915_v41, %v901_v24  ;;  %v1042_v59 = vmul.f32 %v2423_v11, %v2065_v9  ;;  %v2431_v55 = vstv %s2403_s25  ;;  %v2434_v61 = vstv %s2406_s26 }
  0xdf   :  { %v859_v38 = vadd.f32 %v852_v14, %v782_v16  ;;  %v971_v40 = vadd.f32 %v964_v19, %v957_v48  ;;  %v1064_v47 = vmul.f32 %v2431_v55, %v2067_v30  ;;  %v1086_v22 = vmul.f32 %v2434_v61, %v2086_v28 }
  0xe0   :  { %v929_v37 = vmax.f32 %v922_v10, 0.0  ;;  %v1049_v56 = vadd.f32 %v1042_v59, %v1027_v53  ;;  %v1107_v0 = vmul.f32 %v2418_v8, %v2065_v9  ;;  %v1121_v34 = vmul.f32 %v2423_v11, %v2069_v5 }
  0xe1   :  { %v992_v46 = vadd.f32 %v985_v54, %v971_v40  ;;  %v1135_v52 = vmul.f32 %v2431_v55, %v2086_v28  ;;  %v1156_v62 = vmul.f32 %v2434_v61, %v2088_v42  ;;  %v1184_v45 = vmul.f32 %v2418_v8, %v2067_v30 }
  0xe2   :  { %v936_v7 = vadd.f32 %v929_v37, %v859_v38  ;;  %v1071_v41 = vadd.f32 %v1064_v47, %v1049_v56  ;;  %v1128_v3 = vadd.f32 %v1121_v34, %v1107_v0  ;;  %v1191_v58 = vmul.f32 %v2423_v11, %v2086_v28 }
  0xe3   :  { %v999_v9 = vmax.f32 %v992_v46, 0.0  ;;  %v1212_v5 = vmul.f32 %v2431_v55, %v2099_v49  ;;  %v1233_v13 = vmul.f32 %v2434_v61, %v2101_v1  ;;  %v1261_v18 = vmul.f32 %v2418_v8, %v2086_v28 }
  0xe4   :  { %v1093_v44 = vadd.f32 %v1086_v22, %v1071_v41  ;;  %v1142_v23 = vadd.f32 %v1135_v52, %v1128_v3  ;;  %v1198_v21 = vadd.f32 %v1191_v58, %v1184_v45  ;;  %v1268_v30 = vmul.f32 %v2423_v11, %v2088_v42 }
  0xe5   :  { %v1006_v19 = vadd.f32 %v999_v9, %v936_v7  ;;  %v1282_v54 = vmul.f32 %v2431_v55, %v2101_v1  ;;  %v1303_v39 = vmul.f32 %v2434_v61, %v2111_v50  ;;  %v1028_v49 = vmul.f32 %v2418_v8, %v2113_v43 }
  0xe6   :  { %v1100_v16 = vmax.f32 %v1093_v44, 0.0  ;;  %v1163_v24 = vadd.f32 %v1156_v62, %v1142_v23  ;;  %v1219_v14 = vadd.f32 %v1212_v5, %v1198_v21  ;;  %v1275_v28 = vadd.f32 %v1268_v30, %v1261_v18 }
  0xe7   :  { %1369 = vst [vmem:[%s2666_s2 + $0xa0] sm:$0x1] %v1006_v19  ;;  %v1043_v42 = vmul.f32 %v2423_v11, %v2121_v15  ;;  %v1065_v1 = vmul.f32 %v2431_v55, %v2125_v60  ;;  %v1087_v50 = vmul.f32 %v2434_v61, %v2140_v27  ;;  %v1108_v43 = vmul.f32 %v2418_v8, %v2121_v15 }
  0xe8   :  { %v1170_v48 = vmax.f32 %v1163_v24, 0.0  ;;  %v1240_v53 = vadd.f32 %v1233_v13, %v1219_v14  ;;  %v1289_v10 = vadd.f32 %v1282_v54, %v1275_v28  ;;  %v1122_v59 = vmul.f32 %v2423_v11, %v2133_v6 }
  0xe9   :  { %v1050_v38 = vadd.f32 %v1043_v42, %v1028_v49  ;;  %v1136_v40 = vmul.f32 %v2431_v55, %v2140_v27  ;;  %v1157_v47 = vmul.f32 %v2434_v61, %v2142_v35  ;;  %v1185_v22 = vmul.f32 %v2418_v8, %v2125_v60 }
  0xea   :  { %v1177_v37 = vadd.f32 %v1170_v48, %v1100_v16  ;;  %v1247_v56 = vmax.f32 %v1240_v53, 0.0  ;;  %v1310_v0 = vadd.f32 %v1303_v39, %v1289_v10  ;;  %v1129_v15 = vadd.f32 %v1122_v59, %v1108_v43 }
  0xeb   :  { %v1072_v34 = vadd.f32 %v1065_v1, %v1050_v38  ;;  %v1192_v46 = vmul.f32 %v2423_v11, %v2140_v27  ;;  %v1213_v6 = vmul.f32 %v2431_v55, %v2152_v63  ;;  %v1234_v52 = vmul.f32 %v2434_v61, %v2154_v26 }
  0xec   :  { %v1254_v62 = vadd.f32 %v1247_v56, %v1177_v37  ;;  %v1317_v45 = vmax.f32 %v1310_v0, 0.0  ;;  %v1143_v7 = vadd.f32 %v1136_v40, %v1129_v15  ;;  %v1262_v60 = vmul.f32 %v2418_v8, %v2140_v27 }
  0xed   :  { %v1094_v41 = vadd.f32 %v1087_v50, %v1072_v34  ;;  %v1199_v3 = vadd.f32 %v1192_v46, %v1185_v22  ;;  %v1269_v58 = vmul.f32 %v2423_v11, %v2142_v35  ;;  %v1283_v9 = vmul.f32 %v2431_v55, %v2154_v26  ;;  %v2813_v46 = vld [vmem:[#allocation9_spill] sm:$0xff] }
  0xee   :  { %v1324_v5 = vadd.f32 %v1317_v45, %v1254_v62  ;;  %v1164_v13 = vadd.f32 %v1157_v47, %v1143_v7  ;;  %v1304_v63 = vmul.f32 %v2434_v61, %v2162_v17  ;;  %v1029_v18 = vmul.f32 %v2418_v8, %v2172_v32 }
  0xef   :  { %v1101_v44 = vmax.f32 %v1094_v41, 0.0  ;;  %v1220_v23 = vadd.f32 %v1213_v6, %v1199_v3  ;;  %v1276_v21 = vadd.f32 %v1269_v58, %v1262_v60  ;;  %v1044_v27 = vmul.f32 %v2423_v11, %v2174_v31 }
  0xf0   :  { %1374 = vst [vmem:[%s2666_s2 + $0xa8] sm:$0xff] %v1324_v5  ;;  %v1171_v35 = vmax.f32 %v1164_v13, 0.0  ;;  %v1066_v26 = vmul.f32 %v2431_v55, %v2176_v51  ;;  %v1088_v17 = vmul.f32 %v2434_v61, %v2188_v12  ;;  %v1109_v32 = vmul.f32 %v2418_v8, %v2174_v31 }
  0xf1   :  { %v1241_v30 = vadd.f32 %v1234_v52, %v1220_v23  ;;  %v1290_v19 = vadd.f32 %v1283_v9, %v1276_v21  ;;  %v1051_v54 = vadd.f32 %v1044_v27, %v1029_v18  ;;  %v1123_v39 = vmul.f32 %v2423_v11, %v2184_v36  ;;  %v2816_v9 = vld [vmem:[#allocation11_spill] sm:$0xff]  ;;  %v2817_v21 = vld [vmem:[#allocation12_spill] sm:$0xff] }
  0xf2   :  { %v1178_v49 = vadd.f32 %v1171_v35, %v1101_v44  ;;  %v1137_v16 = vmul.f32 %v2431_v55, %v2188_v12  ;;  %v1158_v24 = vmul.f32 %v2434_v61, %v2194_v4  ;;  %v1186_v14 = vmul.f32 %v2418_v8, %v2176_v51  ;;  %v2818_v35 = vld [vmem:[#allocation13_spill] sm:$0xff] }
  0xf3   :  { %v1248_v28 = vmax.f32 %v1241_v30, 0.0  ;;  %v1311_v42 = vadd.f32 %v1304_v63, %v1290_v19  ;;  %v1073_v1 = vadd.f32 %v1066_v26, %v1051_v54  ;;  %v1130_v31 = vadd.f32 %v1123_v39, %v1109_v32 }
  0xf4   :  { %v1193_v50 = vmul.f32 %v2423_v11, %v2188_v12  ;;  %v1214_v36 = vmul.f32 %v2431_v55, %v2207_v57  ;;  %v1235_v43 = vmul.f32 %v2434_v61, %v2209_v33  ;;  %v1263_v48 = vmul.f32 %v2418_v8, %v2188_v12 }
  0xf5   :  { %v1255_v53 = vadd.f32 %v1248_v28, %v1178_v49  ;;  %v1318_v10 = vmax.f32 %v1311_v42, 0.0  ;;  %v1095_v59 = vadd.f32 %v1088_v17, %v1073_v1  ;;  %v1144_v51 = vadd.f32 %v1137_v16, %v1130_v31  ;;  %v2820_v31 = vld [vmem:[#allocation15_spill] sm:$0xff] }
  0xf6   :  { %v1200_v38 = vadd.f32 %v1193_v50, %v1186_v14  ;;  %v1270_v40 = vmul.f32 %v2423_v11, %v2194_v4  ;;  %v1284_v47 = vmul.f32 %v2431_v55, %v2209_v33  ;;  %v1305_v57 = vmul.f32 %v2434_v61, %v2217_v29  ;;  %v2814_v29 = vld [vmem:[#allocation10_spill] sm:$0xff] }
  0xf7   :  { %v1325_v22 = vadd.f32 %v1318_v10, %v1255_v53  ;;  %v1102_v37 = vmax.f32 %v1095_v59, 0.0  ;;  %v1165_v56 = vadd.f32 %v1158_v24, %v1144_v51  ;;  %v1030_v12 = vmul.f32 %v2418_v8, %v2225_v25  ;;  %v2815_v25 = vld [vmem:[#allocation8_spill] sm:$0xff]  ;;  %v2819_v24 = vld [vmem:[#allocation14_spill] sm:$0xff] }
  0xf8   :  { %v1221_v0 = vadd.f32 %v1214_v36, %v1200_v38  ;;  %v1277_v15 = vadd.f32 %v1270_v40, %v1263_v48  ;;  %v1045_v34 = vmul.f32 %v2423_v11, %v2227_v2  ;;  %v1067_v4 = vmul.f32 %v2431_v55, %v2813_v46  ;;  %v2821_v48 = vld [vmem:[#allocation16_spill] sm:$0xff]  ;;  %v2822_v10 = vld [vmem:[#allocation18_spill] sm:$0xff]  ;;  %v2823_v38 = vld [vmem:[#allocation19_spill] sm:$0xff] }
  0xf9   :  { %1375 = vst [vmem:[%s2666_s2 + $0xb0] sm:$0xff] %v1325_v22  ;;  %v1172_v33 = vmax.f32 %v1165_v56, 0.0  ;;  %v1089_v6 = vmul.f32 %v2434_v61, %v2814_v29  ;;  %v1110_v52 = vmul.f32 %v2418_v8, %v2227_v2  ;;  %v1124_v62 = vmul.f32 %v2423_v11, %v2815_v25  ;;  %v2826_v25 = vld [vmem:[#allocation21_spill] sm:$0xff] }
  0xfa   :  { %v1242_v45 = vadd.f32 %v1235_v43, %v1221_v0  ;;  %v1291_v7 = vadd.f32 %v1284_v47, %v1277_v15  ;;  %v1052_v60 = vadd.f32 %v1045_v34, %v1030_v12  ;;  %v1138_v41 = vmul.f32 %v2431_v55, %v2814_v29 }
  0xfb   :  { %v1179_v3 = vadd.f32 %v1172_v33, %v1102_v37  ;;  %v1131_v58 = vadd.f32 %v1124_v62, %v1110_v52  ;;  %v1159_v5 = vmul.f32 %v2434_v61, %v2816_v9  ;;  %v1187_v13 = vmul.f32 %v2418_v8, %v2813_v46  ;;  %v2825_v46 = vld [vmem:[#allocation20_spill] sm:$0xff] }
  0xfc   :  { %v1249_v63 = vmax.f32 %v1242_v45, 0.0  ;;  %v1312_v18 = vadd.f32 %v1305_v57, %v1291_v7  ;;  %v1074_v2 = vadd.f32 %v1067_v4, %v1052_v60  ;;  %v1194_v44 = vmul.f32 %v2423_v11, %v2814_v29  ;;  %v2824_v57 = vld [vmem:[#allocation17_spill] sm:$0xff]  ;;  %v2827_v60 = vld [vmem:[#allocation22_spill] sm:$0xff] }
  0xfd   :  { %v1145_v23 = vadd.f32 %v1138_v41, %v1131_v58  ;;  %v1215_v27 = vmul.f32 %v2431_v55, %v2817_v21  ;;  %v1236_v26 = vmul.f32 %v2434_v61, %v2818_v35  ;;  %v1264_v17 = vmul.f32 %v2418_v8, %v2814_v29 }
  0xfe   :  { %v1256_v32 = vadd.f32 %v1249_v63, %v1179_v3  ;;  %v1319_v30 = vmax.f32 %v1312_v18, 0.0  ;;  %v1096_v19 = vadd.f32 %v1089_v6, %v1074_v2  ;;  %v1201_v54 = vadd.f32 %v1194_v44, %v1187_v13  ;;  %v2828_v2 = vld [vmem:[#allocation23_spill] sm:$0xff] }
  0xff   :  { %v1166_v39 = vadd.f32 %v1159_v5, %v1145_v23  ;;  %v1271_v49 = vmul.f32 %v2423_v11, %v2816_v9  ;;  %v1285_v16 = vmul.f32 %v2431_v55, %v2818_v35  ;;  %v1306_v14 = vmul.f32 %v2434_v61, %v2819_v24  ;;  %v2829_v23 = vld [vmem:[#allocation24_spill] sm:$0xff] }
 0x100   :  { %v1326_v28 = vadd.f32 %v1319_v30, %v1256_v32  ;;  %v1103_v42 = vmax.f32 %v1096_v19, 0.0  ;;  %v1222_v1 = vadd.f32 %v1215_v27, %v1201_v54  ;;  %v1031_v50 = vmul.f32 %v2418_v8, %v2820_v31  ;;  %v2830_v30 = vld [vmem:[#allocation25_spill] sm:$0xff]  ;;  %v2831_v54 = vld [vmem:[#allocation27_spill] sm:$0xff] }
 0x101   :  { %v1173_v36 = vmax.f32 %v1166_v39, 0.0  ;;  %v1278_v43 = vadd.f32 %v1271_v49, %v1264_v17  ;;  %v1046_v53 = vmul.f32 %v2423_v11, %v2821_v48  ;;  %v1068_v59 = vmul.f32 %v2431_v55, %v2822_v10  ;;  %v2832_v49 = vld [vmem:[#allocation28_spill] sm:$0xff] }
 0x102   :  { %1376 = vst [vmem:[%s2666_s2 + $0xb8] sm:$0xff] %v1326_v28  ;;  %v1243_v51 = vadd.f32 %v1236_v26, %v1222_v1  ;;  %v1090_v40 = vmul.f32 %v2434_v61, %v2823_v38  ;;  %v1111_v47 = vmul.f32 %v2418_v8, %v2821_v48  ;;  %v1125_v22 = vmul.f32 %v2423_v11, %v2824_v57  ;;  %v2835_v57 = vld [vmem:[#allocation30_spill] sm:$0xff] }
 0x103   :  { %v1180_v37 = vadd.f32 %v1173_v36, %v1103_v42  ;;  %v1292_v56 = vadd.f32 %v1285_v16, %v1278_v43  ;;  %v1053_v12 = vadd.f32 %v1046_v53, %v1031_v50  ;;  %v1139_v0 = vmul.f32 %v2431_v55, %v2823_v38  ;;  %v2833_v42 = vld [vmem:[#allocation26_spill] sm:$0xff] }
 0x104   :  { %v1250_v15 = vmax.f32 %v1243_v51, 0.0  ;;  %v1132_v34 = vadd.f32 %v1125_v22, %v1111_v47  ;;  %v1160_v4 = vmul.f32 %v2434_v61, %v2825_v46  ;;  %v1188_v33 = vmul.f32 %v2418_v8, %v2822_v10 }
 0x105   :  { %v1313_v29 = vadd.f32 %v1306_v14, %v1292_v56  ;;  %v1075_v6 = vadd.f32 %v1068_v59, %v1053_v12  ;;  %v1195_v52 = vmul.f32 %v2423_v11, %v2823_v38  ;;  %v1216_v62 = vmul.f32 %v2431_v55, %v2826_v25 }
 0x106   :  { %v1257_v45 = vadd.f32 %v1250_v15, %v1180_v37  ;;  %v1146_v7 = vadd.f32 %v1139_v0, %v1132_v34  ;;  %v1237_v41 = vmul.f32 %v2434_v61, %v2827_v60  ;;  %v1265_v3 = vmul.f32 %v2418_v8, %v2823_v38  ;;  %v1025_v37 = vld [vmem:[#allocation5 + $0x30] sm:$0x1]  ;;  %v1040_v34 = vld [vmem:[#allocation5 + $0x68] sm:$0x1] }
 0x107   :  { %v1320_v58 = vmax.f32 %v1313_v29, 0.0  ;;  %v1097_v9 = vadd.f32 %v1090_v40, %v1075_v6  ;;  %v1202_v5 = vadd.f32 %v1195_v52, %v1188_v33  ;;  %v1272_v13 = vmul.f32 %v2423_v11, %v2825_v46  ;;  %v2834_v40 = vld [vmem:[#allocation29_spill] sm:$0xff]  ;;  %v1062_v6 = vld [vmem:[#allocation5 + $0xd8] sm:$0x1] }
 0x108   :  { %v1167_v63 = vadd.f32 %v1160_v4, %v1146_v7  ;;  %v1286_v18 = vmul.f32 %v2431_v55, %v2827_v60  ;;  %v1307_v44 = vmul.f32 %v2434_v61, %v2828_v2  ;;  %v1032_v21 = vmul.f32 %v2418_v8, %v2829_v23  ;;  %v1120_v60 = vld [vmem:[#allocation5 + $0xa0] sm:$0x1] }
 0x109   :  { %v1327_v27 = vadd.f32 %v1320_v58, %v1257_v45  ;;  %v1104_v35 = vmax.f32 %v1097_v9, 0.0  ;;  %v1223_v26 = vadd.f32 %v1216_v62, %v1202_v5  ;;  %v1279_v17 = vadd.f32 %v1272_v13, %v1265_v3  ;;  %v2836_v62 = vld [vmem:[#allocation31_spill] sm:$0xff]  ;;  %v1155_v13 = vld [vmem:[#allocation5 + $0x148] sm:$0x1] }
 0x10a   :  { %v1174_v32 = vmax.f32 %v1167_v63, 0.0  ;;  %v1047_v19 = vmul.f32 %v2423_v11, %v2830_v30  ;;  %v1069_v39 = vmul.f32 %v2431_v55, %v2831_v54  ;;  %v1091_v16 = vmul.f32 %v2434_v61, %v2832_v49  ;;  %v1084_v5 = vld [vmem:[#allocation5 + $0x110] sm:$0x1] }
 0x10b   :  { %1377 = vst [vmem:[%s2666_s2 + $0xc0] sm:$0xff] %v1327_v27  ;;  %v1244_v24 = vadd.f32 %v1237_v41, %v1223_v26  ;;  %v1293_v14 = vadd.f32 %v1286_v18, %v1279_v17  ;;  %v1112_v28 = vmul.f32 %v2418_v8, %v2830_v30  ;;  %v1126_v1 = vmul.f32 %v2423_v11, %v2833_v42 }
 0x10c   :  { %v1181_v31 = vadd.f32 %v1174_v32, %v1104_v35  ;;  %v1054_v50 = vadd.f32 %v1047_v19, %v1032_v21  ;;  %v1140_v36 = vmul.f32 %v2431_v55, %v2832_v49  ;;  %v1161_v43 = vmul.f32 %v2434_v61, %v2351_v20  ;;  %v1211_v35 = vld [vmem:[#allocation5 + $0x180] sm:$0x1] }
 0x10d   :  { %v1251_v48 = vmax.f32 %v1244_v24, 0.0  ;;  %v1314_v53 = vadd.f32 %v1307_v44, %v1293_v14  ;;  %v1133_v10 = vadd.f32 %v1126_v1, %v1112_v28  ;;  %v1189_v59 = vmul.f32 %v2418_v8, %v2831_v54 }
 0x10e   :  { %v1076_v51 = vadd.f32 %v1069_v39, %v1054_v50  ;;  %v1196_v38 = vmul.f32 %v2423_v11, %v2832_v49  ;;  %v1217_v47 = vmul.f32 %v2431_v55, %v2834_v40  ;;  %v1238_v22 = vmul.f32 %v2434_v61, %v2835_v57 }
 0x10f   :  { %v1258_v56 = vadd.f32 %v1251_v48, %v1181_v31  ;;  %v1321_v12 = vmax.f32 %v1314_v53, 0.0  ;;  %v1147_v0 = vadd.f32 %v1140_v36, %v1133_v10  ;;  %v1266_v15 = vmul.f32 %v2418_v8, %v2832_v49  ;;  %v1302_v36 = vld [vmem:[#allocation5 + $0x1f0] sm:$0x1] }
 0x110   :  { %v1098_v46 = vadd.f32 %v1091_v16, %v1076_v51  ;;  %v1203_v4 = vadd.f32 %v1196_v38, %v1189_v59  ;;  %v1273_v33 = vmul.f32 %v2423_v11, %v2351_v20  ;;  %v1287_v29 = vmul.f32 %v2431_v55, %v2835_v57  ;;  %v1232_v16 = vld [vmem:[#allocation5 + $0x1b8] sm:$0x1] }
 0x111   :  { %v1328_v52 = vadd.f32 %v1321_v12, %v1258_v56  ;;  %v1168_v25 = vadd.f32 %v1161_v43, %v1147_v0  ;;  %v1308_v45 = vmul.f32 %v2434_v61, %v2836_v62  ;;  %v1033_v7 = vmul.f32 %v2418_v8, %v1025_v37 }
 0x112   :  { %v1105_v41 = vmax.f32 %v1098_v46, 0.0  ;;  %v1224_v3 = vadd.f32 %v1217_v47, %v1203_v4  ;;  %v1280_v58 = vadd.f32 %v1273_v33, %v1266_v15  ;;  %v1048_v9 = vmul.f32 %v2423_v11, %v1040_v34 }
 0x113   :  { %1378 = vst [vmem:[%s2666_s2 + $0xc8] sm:$0xff] %v1328_v52  ;;  %v1175_v20 = vmax.f32 %v1168_v25, 0.0  ;;  %v1070_v63 = vmul.f32 %v2431_v55, %v1062_v6  ;;  %v1092_v18 = vmul.f32 %v2434_v61, %v1084_v5  ;;  %v1113_v2 = vmul.f32 %v1040_v34, %v2418_v8 }
 0x114   :  { %v1245_v44 = vadd.f32 %v1238_v22, %v1224_v3  ;;  %v1294_v23 = vadd.f32 %v1287_v29, %v1280_v58  ;;  %v1055_v21 = vadd.f32 %v1048_v9, %v1033_v7  ;;  %v1127_v27 = vmul.f32 %v1120_v60, %v2423_v11 }
 0x115   :  { %v1182_v26 = vadd.f32 %v1175_v20, %v1105_v41  ;;  %v1141_v17 = vmul.f32 %v1084_v5, %v2431_v55  ;;  %v1162_v32 = vmul.f32 %v1155_v13, %v2434_v61  ;;  %v1190_v30 = vmul.f32 %v1062_v6, %v2418_v8 }
 0x116   :  { %v1252_v19 = vmax.f32 %v1245_v44, 0.0  ;;  %v1315_v54 = vadd.f32 %v1308_v45, %v1294_v23  ;;  %v1077_v39 = vadd.f32 %v1070_v63, %v1055_v21  ;;  %v1134_v49 = vadd.f32 %v1127_v27, %v1113_v2 }
 0x117   :  { %v1197_v24 = vmul.f32 %v1084_v5, %v2423_v11  ;;  %v1218_v14 = vmul.f32 %v1211_v35, %v2431_v55  ;;  %v1267_v28 = vmul.f32 %v1084_v5, %v2418_v8  ;;  %v1239_v48 = vmul.f32 %v1232_v16, %v2434_v61 }
 0x118   :  { %v1259_v42 = vadd.f32 %v1252_v19, %v1182_v26  ;;  %v1322_v1 = vmax.f32 %v1315_v54, 0.0  ;;  %v1099_v31 = vadd.f32 %v1092_v18, %v1077_v39  ;;  %v1148_v50 = vadd.f32 %v1141_v17, %v1134_v49 }
 0x119   :  { %v1204_v43 = vadd.f32 %v1197_v24, %v1190_v30  ;;  %v1274_v53 = vmul.f32 %v1155_v13, %v2423_v11  ;;  %v1288_v10 = vmul.f32 %v1232_v16, %v2431_v55  ;;  %v1309_v57 = vmul.f32 %v1302_v36, %v2434_v61 }
 0x11a   :  { %v1329_v59 = vadd.f32 %v1322_v1, %v1259_v42  ;;  %v1106_v51 = vmax.f32 %v1099_v31, 0.0  ;;  %v1169_v38 = vadd.f32 %v1162_v32, %v1148_v50 }
 0x11b   :  { %v1225_v40 = vadd.f32 %v1218_v14, %v1204_v43  ;;  %v1281_v47 = vadd.f32 %v1274_v53, %v1267_v28 }
 0x11c   :  { %1379 = vst [vmem:[%s2666_s2 + $0xd0] sm:$0xff] %v1329_v59  ;;  %v1176_v8 = vmax.f32 %v1169_v38, 0.0 }
 0x11d   :  { %v1246_v22 = vadd.f32 %v1239_v48, %v1225_v40  ;;  %v1295_v37 = vadd.f32 %v1288_v10, %v1281_v47 }
 0x11e   :  { %v1183_v56 = vadd.f32 %v1176_v8, %v1106_v51 }
 0x11f   :  { %v1253_v12 = vmax.f32 %v1246_v22, 0.0  ;;  %v1316_v0 = vadd.f32 %v1309_v57, %v1295_v37 }
 0x121   :  { %v1260_v11 = vadd.f32 %v1253_v12, %v1183_v56  ;;  %v1323_v15 = vmax.f32 %v1316_v0, 0.0 }
 0x123   :  { %v1330_v55 = vadd.f32 %v1323_v15, %v1260_v11 }
 0x125   :  { %1380 = vst [vmem:[%s2666_s2 + $0xd8] sm:$0x1] %v1330_v55 }
 0x126   :  { %1343 = vsyncpa [#allocation3], 1 }
 0x127   :  { %1344 = vsyncpa [#allocation4], 1 }

</bundles_post_ra>
